<compile_context>
chip_gen: v7x
topology: tpu7x:2x2x1
jax: 0.10.0
libtpu: 0.0.40
codegen_flags: <defaults>
</compile_context>

<pallas_src>
import functools
import math

import jax
import jax.numpy as jnp
import numpy as np
from jax.experimental import pallas as pl
from jax.experimental.pallas import tpu as pltpu

# ------------------------- config (small, synthetic) -------------------------
N_ENC_VOCAB = 32
N_SEQ = 8            # n_dec_seq == sequence length
N_SEG_TYPE = 2
D_HIDN = 32
N_HEAD = 4
D_HEAD = 8
D_FF = 64
N_LAYER = 2
I_PAD = 0
LN_EPS = 1e-12
SCALE = 1.0 / math.sqrt(D_HEAD)
NEG_INF = -1e9       # torch code uses -1000000000.0


# ------------------------------ in-kernel math ------------------------------
def _erf(x):
    # Abramowitz & Stegun 7.1.26 (max abs err 1.5e-7): f32-exact erf built only
    # from ops guaranteed to lower on Mosaic (exp / mul / add / where).
    p = 0.3275911
    a1, a2, a3, a4, a5 = 0.254829592, -0.284496736, 1.421413741, -1.453152027, 1.061405429
    sgn = jnp.where(x >= 0.0, 1.0, -1.0)
    ax = jnp.abs(x)
    t = 1.0 / (1.0 + p * ax)
    poly = t * (a1 + t * (a2 + t * (a3 + t * (a4 + t * a5))))
    return sgn * (1.0 - poly * jnp.exp(-ax * ax))


def _gelu(x):
    # exact (erf-based) GELU, matching torch.nn.functional.gelu default
    return 0.5 * x * (1.0 + _erf(x * (1.0 / math.sqrt(2.0))))


# ------------------------------- Pallas kernel -------------------------------
def fused_encoder_kernel(x_ref, mask_ref,
                         wq_ref, bq_ref, wk_ref, bk_ref, wv_ref, bv_ref,
                         wo_ref, bo_ref, g1_ref, be1_ref,
                         w1_ref, cb1_ref, w2_ref, cb2_ref, g2_ref, be2_ref,
                         out_ref, attn_ref, *, batch, seq):
    """One grid step == one EncoderLayer applied to the whole batch."""
    layer = pl.program_id(0)

    # Layer 0: seed the resident activation (the revisited output block) with
    # the embeddings.  For layer > 0 the block already holds layer l-1 output.
    @pl.when(layer == 0)
    def _():
        out_ref[...] = x_ref[...]

    x2 = out_ref[...]                      # (B*S, D) resident activation
    key_pad = mask_ref[...] != 0.0         # (B, S) True where key pos is <pad>

    def layer_norm(h, g_ref, b_ref):
        mu = jnp.mean(h, axis=-1, keepdims=True)
        var = jnp.mean(jnp.square(h - mu), axis=-1, keepdims=True)
        return (h - mu) * jax.lax.rsqrt(var + LN_EPS) * g_ref[0] + b_ref[0]

    # --- multi-head self attention (per-head weights, batch-batched einsums) ---
    att_sum = jnp.zeros((batch * seq, D_HIDN), jnp.float32)
    for h in range(N_HEAD):                # static unroll, H=4
        qh = jnp.dot(x2, wq_ref[0, h], preferred_element_type=jnp.float32) + bq_ref[0, h]
        kh = jnp.dot(x2, wk_ref[0, h], preferred_element_type=jnp.float32) + bk_ref[0, h]
        vh = jnp.dot(x2, wv_ref[0, h], preferred_element_type=jnp.float32) + bv_ref[0, h]
        qh3 = qh.reshape(batch, seq, D_HEAD)
        kh3 = kh.reshape(batch, seq, D_HEAD)
        vh3 = vh.reshape(batch, seq, D_HEAD)
        sc = jnp.einsum("bqd,bkd->bqk", qh3, kh3,
                        preferred_element_type=jnp.float32) * SCALE     # (B,S,S)
        sc = jnp.where(key_pad[:, None, :], NEG_INF, sc)
        prob = jax.nn.softmax(sc, axis=-1)                              # (B,S,S)
        attn_ref[0, h * batch:(h + 1) * batch] = prob
        ctx = jnp.einsum("bqk,bkd->bqd", prob, vh3,
                         preferred_element_type=jnp.float32)            # (B,S,Dh)
        # output projection folded per head: concat(ctx) @ Wo == sum_h ctx_h @ Wo_h
        att_sum = att_sum + jnp.dot(ctx.reshape(batch * seq, D_HEAD), wo_ref[0, h],
                                    preferred_element_type=jnp.float32)
    att_out = att_sum + bo_ref[0]
    # (attention/output dropout are identity at inference)

    h1 = layer_norm(x2 + att_out, g1_ref, be1_ref)

    # --- position-wise FFN (Conv1d k=1 == Linear) ---
    f = _gelu(jnp.dot(h1, w1_ref[0], preferred_element_type=jnp.float32) + cb1_ref[0])
    f = jnp.dot(f, w2_ref[0], preferred_element_type=jnp.float32) + cb2_ref[0]

    out_ref[...] = layer_norm(f + h1, g2_ref, be2_ref)


# ------------------------------ wrapper / glue --------------------------------
def _stack_layer_params(layers):
    """Stack per-layer params along a leading layer axis, pre-split per head."""
    H, Dh, D = N_HEAD, D_HEAD, D_HIDN

    def st(fn):
        return jnp.stack([fn(lp) for lp in layers], axis=0)

    packed = {
        "wq": st(lambda p: p["wq"].reshape(D, H, Dh).transpose(1, 0, 2)),   # (L,H,D,Dh)
        "bq": st(lambda p: p["bq"].reshape(H, Dh)[:, None, :]),             # (L,H,1,Dh)
        "wk": st(lambda p: p["wk"].reshape(D, H, Dh).transpose(1, 0, 2)),
        "bk": st(lambda p: p["bk"].reshape(H, Dh)[:, None, :]),
        "wv": st(lambda p: p["wv"].reshape(D, H, Dh).transpose(1, 0, 2)),
        "bv": st(lambda p: p["bv"].reshape(H, Dh)[:, None, :]),
        "wo": st(lambda p: p["wo"].reshape(H, Dh, D)),                      # (L,H,Dh,D)
        "bo": st(lambda p: p["bo"]),                                        # (L,1,D)
        "g1": st(lambda p: p["g1"]), "b1": st(lambda p: p["b1"]),
        "w1": st(lambda p: p["w1"]), "cb1": st(lambda p: p["cb1"]),
        "w2": st(lambda p: p["w2"]), "cb2": st(lambda p: p["cb2"]),
        "g2": st(lambda p: p["g2"]), "b2": st(lambda p: p["b2"]),
    }
    order = ("wq", "bq", "wk", "bk", "wv", "bv", "wo", "bo",
             "g1", "b1", "w1", "cb1", "w2", "cb2", "g2", "b2")
    return [packed[k] for k in order]


def spanbert_encoder_pallas(x_emb, pad_mask, layer_params):
    """x_emb: (B,S,D) f32 embeddings; pad_mask: (B,S) f32 (1.0 where <pad>)."""
    B, S, D = x_emb.shape
    N = B * S
    x2 = x_emb.reshape(N, D)
    weights = _stack_layer_params(layer_params)

    def layer_spec(arr):
        nd = arr.ndim
        return pl.BlockSpec((1,) + arr.shape[1:],
                            lambda l, _nd=nd: (l,) + (0,) * (_nd - 1))

    in_specs = ([pl.BlockSpec((N, D), lambda l: (0, 0)),        # activation (loaded once)
                 pl.BlockSpec((B, S), lambda l: (0, 0))]        # pad mask
                + [layer_spec(w) for w in weights])
    out_specs = (pl.BlockSpec((N, D), lambda l: (0, 0)),                      # resident x
                 pl.BlockSpec((1, N_HEAD * B, S, S), lambda l: (l, 0, 0, 0)))  # per-layer probs
    out_shape = (jax.ShapeDtypeStruct((N, D), jnp.float32),
                 jax.ShapeDtypeStruct((N_LAYER, N_HEAD * B, S, S), jnp.float32))

    per_layer_flops = (3 * 2 * N * D * (N_HEAD * D_HEAD)        # QKV projections
                       + 2 * 2 * B * N_HEAD * S * S * D_HEAD    # scores + context
                       + 2 * N * (N_HEAD * D_HEAD) * D          # output projection
                       + 2 * 2 * N * D * D_FF)                  # FFN
    cost = pl.CostEstimate(
        flops=N_LAYER * per_layer_flops,
        transcendentals=N_LAYER * (B * N_HEAD * S * S + N * D_FF),
        bytes_accessed=4 * (x2.size + pad_mask.size
                            + sum(int(w.size) for w in weights)
                            + N * D + N_LAYER * N_HEAD * B * S * S))

    kernel = functools.partial(fused_encoder_kernel, batch=B, seq=S)
    out2, attn_all = pl.pallas_call(
        kernel,
        grid=(N_LAYER,),
        in_specs=in_specs,
        out_specs=out_specs,
        out_shape=out_shape,
        compiler_params=pltpu.CompilerParams(dimension_semantics=("arbitrary",)),
        cost_estimate=cost,
    )(x2, pad_mask, *weights)

    x_out = out2.reshape(B, S, D)
    attn5 = attn_all.reshape(N_LAYER, N_HEAD, B, S, S)
    attn_probs = [jnp.transpose(attn5[l], (1, 0, 2, 3)) for l in range(N_LAYER)]
    return x_out, attn_probs


def spanbert_forward(inputs, segments, params):
    """inputs, segments: (B, S) int32.  Returns (outputs (B,S,D), [attn_prob])."""
    B, S = inputs.shape
    positions = jnp.where(inputs == I_PAD, 0,
                          jnp.arange(1, S + 1, dtype=inputs.dtype)[None, :])
    x = (params["enc_emb"][inputs]
         + params["pos_emb"][positions]
         + params["seg_emb"][segments]).astype(jnp.float32)
    pad_mask = (inputs == I_PAD).astype(jnp.float32)        # (B, S)
    return spanbert_encoder_pallas(x, pad_mask, params["layers"])


# ------------------------- pure-JAX reference (check) -------------------------
def _ref_layer(x, key_pad, p):
    def lin(h, w, b):
        return h @ w + b[0]
    B, S, _ = x.shape
    q = lin(x, p["wq"], p["bq"]).reshape(B, S, N_HEAD, D_HEAD)
    k = lin(x, p["wk"], p["bk"]).reshape(B, S, N_HEAD, D_HEAD)
    v = lin(x, p["wv"], p["bv"]).reshape(B, S, N_HEAD, D_HEAD)
    q, k, v = (t.transpose(0, 2, 1, 3) for t in (q, k, v))        # (B,H,S,Dh)
    scores = jnp.einsum("bhqd,bhkd->bhqk", q, k) * SCALE
    scores = jnp.where(key_pad[:, None, :, :], NEG_INF, scores)
    prob = jax.nn.softmax(scores, axis=-1)
    ctx = jnp.einsum("bhqk,bhkd->bhqd", prob, v).transpose(0, 2, 1, 3)
    ctx = ctx.reshape(B, S, N_HEAD * D_HEAD)
    att = lin(ctx, p["wo"], p["bo"])

    def ln(h, g, b):
        mu = h.mean(-1, keepdims=True)
        var = ((h - mu) ** 2).mean(-1, keepdims=True)
        return (h - mu) / jnp.sqrt(var + LN_EPS) * g[0] + b[0]

    h1 = ln(x + att, p["g1"], p["b1"])
    f = jax.nn.gelu(lin(h1, p["w1"], p["cb1"]), approximate=False)
    f = lin(f, p["w2"], p["cb2"])
    return ln(f + h1, p["g2"], p["b2"]), prob


def spanbert_reference(inputs, segments, params):
    B, S = inputs.shape
    positions = jnp.where(inputs == I_PAD, 0,
                          jnp.arange(1, S + 1, dtype=inputs.dtype)[None, :])
    x = (params["enc_emb"][inputs]
         + params["pos_emb"][positions]
         + params["seg_emb"][segments]).astype(jnp.float32)
    key_pad = jnp.broadcast_to((inputs == I_PAD)[:, None, :], (B, S, S))
    probs = []
    for lp in params["layers"]:
        x, p_ = _ref_layer(x, key_pad, lp)
        probs.append(p_)
    return x, probs


# ------------------------------ parameter init --------------------------------
def init_params(key):
    def nrm(k, shape, scale=0.02):
        return (scale * jax.random.normal(k, shape)).astype(jnp.float32)

    keys = jax.random.split(key, 3 + N_LAYER)
    params = {
        "enc_emb": nrm(keys[0], (N_ENC_VOCAB, D_HIDN)),
        "pos_emb": nrm(keys[1], (N_SEQ + 1, D_HIDN)),
        "seg_emb": nrm(keys[2], (N_SEG_TYPE, D_HIDN)),
        "layers": [],
    }
    for li in range(N_LAYER):
        lk = jax.random.split(keys[3 + li], 16)
        hh = N_HEAD * D_HEAD
        layer = {
            "wq": nrm(lk[0], (D_HIDN, hh)), "bq": nrm(lk[1], (1, hh)),
            "wk": nrm(lk[2], (D_HIDN, hh)), "bk": nrm(lk[3], (1, hh)),
            "wv": nrm(lk[4], (D_HIDN, hh)), "bv": nrm(lk[5], (1, hh)),
            "wo": nrm(lk[6], (hh, D_HIDN)), "bo": nrm(lk[7], (1, D_HIDN)),
            "g1": 1.0 + nrm(lk[8], (1, D_HIDN)), "b1": nrm(lk[9], (1, D_HIDN)),
            "w1": nrm(lk[10], (D_HIDN, D_FF)), "cb1": nrm(lk[11], (1, D_FF)),
            "w2": nrm(lk[12], (D_FF, D_HIDN)), "cb2": nrm(lk[13], (1, D_HIDN)),
            "g2": 1.0 + nrm(lk[14], (1, D_HIDN)), "b2": nrm(lk[15], (1, D_HIDN)),
        }
        params["layers"].append(layer)
    return params


# ------------------------------------ main ------------------------------------
if __name__ == "__main__":
    root = jax.random.PRNGKey(0)
    pkey, tkey, skey = jax.random.split(root, 3)
    params = init_params(pkey)

    B = 2
    tokens = jax.random.randint(tkey, (B, N_SEQ), 1, N_ENC_VOCAB, dtype=jnp.int32)
    tokens = tokens.at[0, -2:].set(I_PAD)       # exercise the pad mask
    tokens = tokens.at[1, -1].set(I_PAD)
    segments = jax.random.randint(skey, (B, N_SEQ), 0, N_SEG_TYPE, dtype=jnp.int32)

    outputs, attn_probs = spanbert_forward(tokens, segments, params)
    outputs = jax.block_until_ready(outputs)
    attn_probs = [jax.block_until_ready(a) for a in attn_probs]

    ref_out, ref_probs = spanbert_reference(tokens, segments, params)
    np.testing.assert_allclose(np.asarray(outputs), np.asarray(ref_out),
                               rtol=1e-4, atol=1e-4)
    for a, r in zip(attn_probs, ref_probs):
        np.testing.assert_allclose(np.asarray(a), np.asarray(r),
                                   rtol=1e-4, atol=1e-4)

    print("KERNEL_OK")
</pallas_src>

<mosaic_0001>
module attributes {stable_mosaic.version = 11 : i64} {
  func.func @fused_encoder_kernel(%arg0: i32, %arg1: memref<16x32xf32, #tpu.memory_space<vmem>>, %arg2: memref<2x8xf32, #tpu.memory_space<vmem>>, %arg3: memref<1x4x32x8xf32, #tpu.memory_space<vmem>>, %arg4: memref<1x4x1x8xf32, #tpu.memory_space<vmem>>, %arg5: memref<1x4x32x8xf32, #tpu.memory_space<vmem>>, %arg6: memref<1x4x1x8xf32, #tpu.memory_space<vmem>>, %arg7: memref<1x4x32x8xf32, #tpu.memory_space<vmem>>, %arg8: memref<1x4x1x8xf32, #tpu.memory_space<vmem>>, %arg9: memref<1x4x8x32xf32, #tpu.memory_space<vmem>>, %arg10: memref<1x1x32xf32, #tpu.memory_space<vmem>>, %arg11: memref<1x1x32xf32, #tpu.memory_space<vmem>>, %arg12: memref<1x1x32xf32, #tpu.memory_space<vmem>>, %arg13: memref<1x32x64xf32, #tpu.memory_space<vmem>>, %arg14: memref<1x1x64xf32, #tpu.memory_space<vmem>>, %arg15: memref<1x64x32xf32, #tpu.memory_space<vmem>>, %arg16: memref<1x1x32xf32, #tpu.memory_space<vmem>>, %arg17: memref<1x1x32xf32, #tpu.memory_space<vmem>>, %arg18: memref<1x1x32xf32, #tpu.memory_space<vmem>>, %arg19: memref<16x32xf32, #tpu.memory_space<vmem>>, %arg20: memref<1x8x8x8xf32, #tpu.memory_space<vmem>>) attributes {dimension_semantics = [#tpu.dimension_semantics<arbitrary>], iteration_bounds = array<i64: 2>, scalar_prefetch = 0 : i64, scratch_operands = 0 : i64, tpu.core_type = #tpu.core_type<tc>, window_params = [{pipeline_mode = #tpu.pipeline_mode<synchronous>, transform_indices = @transform_0, window_bounds = array<i64: 16, 32>}, {pipeline_mode = #tpu.pipeline_mode<synchronous>, transform_indices = @transform_1, window_bounds = array<i64: 2, 8>}, {transform_indices = @transform_2, window_bounds = array<i64: 1, 4, 32, 8>}, {transform_indices = @transform_3, window_bounds = array<i64: 1, 4, 1, 8>}, {transform_indices = @transform_4, window_bounds = array<i64: 1, 4, 32, 8>}, {transform_indices = @transform_5, window_bounds = array<i64: 1, 4, 1, 8>}, {transform_indices = @transform_6, window_bounds = array<i64: 1, 4, 32, 8>}, {transform_indices = @transform_7, window_bounds = array<i64: 1, 4, 1, 8>}, {transform_indices = @transform_8, window_bounds = array<i64: 1, 4, 8, 32>}, {transform_indices = @transform_9, window_bounds = array<i64: 1, 1, 32>}, {transform_indices = @transform_10, window_bounds = array<i64: 1, 1, 32>}, {transform_indices = @transform_11, window_bounds = array<i64: 1, 1, 32>}, {transform_indices = @transform_12, window_bounds = array<i64: 1, 32, 64>}, {transform_indices = @transform_13, window_bounds = array<i64: 1, 1, 64>}, {transform_indices = @transform_14, window_bounds = array<i64: 1, 64, 32>}, {transform_indices = @transform_15, window_bounds = array<i64: 1, 1, 32>}, {transform_indices = @transform_16, window_bounds = array<i64: 1, 1, 32>}, {transform_indices = @transform_17, window_bounds = array<i64: 1, 1, 32>}, {pipeline_mode = #tpu.pipeline_mode<synchronous>, transform_indices = @transform_18, window_bounds = array<i64: 16, 32>}, {transform_indices = @transform_19, window_bounds = array<i64: 1, 8, 8, 8>}]} {
    %c0_i32 = arith.constant 0 : i32
    %0 = arith.cmpi eq, %arg0, %c0_i32 : i32
    %1 = arith.extui %0 : i1 to i32
    %c0_i32_0 = arith.constant 0 : i32
    %2 = arith.cmpi ne, %1, %c0_i32_0 : i32
    scf.if %2 {
      %c0_229 = arith.constant 0 : index
      %c0_230 = arith.constant 0 : index
      %330 = vector.load %arg1[%c0_229, %c0_230] : memref<16x32xf32, #tpu.memory_space<vmem>>, vector<16x32xf32>
      %c0_231 = arith.constant 0 : index
      %c0_232 = arith.constant 0 : index
      %331 = vector.load %arg19[%c0_231, %c0_232] : memref<16x32xf32, #tpu.memory_space<vmem>>, vector<16x32xf32>
      tpu.vector_store %arg19[%c0_231, %c0_232], %330 {strides = array<i32>} : memref<16x32xf32, #tpu.memory_space<vmem>>, vector<16x32xf32>,
    } else {
    }
    %c0 = arith.constant 0 : index
    %c0_1 = arith.constant 0 : index
    %3 = vector.load %arg19[%c0, %c0_1] : memref<16x32xf32, #tpu.memory_space<vmem>>, vector<16x32xf32>
    %c0_2 = arith.constant 0 : index
    %c0_3 = arith.constant 0 : index
    %4 = vector.load %arg2[%c0_2, %c0_3] : memref<2x8xf32, #tpu.memory_space<vmem>>, vector<2x8xf32>
    %cst = arith.constant 0.000000e+00 : f32
    %5 = vector.broadcast %cst : f32 to vector<2x8xf32>
    %6 = arith.cmpf one, %4, %5 : vector<2x8xf32>
    %cst_4 = arith.constant 0.000000e+00 : f32
    %7 = vector.broadcast %cst_4 : f32 to vector<16x32xf32>
    %c0_5 = arith.constant 0 : index
    %c0_6 = arith.constant 0 : index
    %c0_7 = arith.constant 0 : index
    %c0_8 = arith.constant 0 : index
    %8 = vector.load %arg3[%c0_5, %c0_6, %c0_7, %c0_8] : memref<1x4x32x8xf32, #tpu.memory_space<vmem>>, vector<1x1x32x8xf32>
    %9 = vector.shape_cast %8 : vector<1x1x32x8xf32> to vector<32x8xf32>
    %cst_9 = arith.constant dense<0.000000e+00> : vector<16x8xf32>
    %10 = tpu.matmul %3, %9, %cst_9 {dimension_numbers = #tpu.dot_dimension_numbers<[1], [0], [0], [1], [0, 0, 1, 1], [], []>} : vector<16x32xf32>, vector<32x8xf32>, vector<16x8xf32> -> vector<16x8xf32>
    %c0_10 = arith.constant 0 : index
    %c0_11 = arith.constant 0 : index
    %c0_12 = arith.constant 0 : index
    %c0_13 = arith.constant 0 : index
    %11 = vector.load %arg4[%c0_10, %c0_11, %c0_12, %c0_13] : memref<1x4x1x8xf32, #tpu.memory_space<vmem>>, vector<1x1x1x8xf32>
    %12 = vector.shape_cast %11 : vector<1x1x1x8xf32> to vector<1x8xf32>
    %13 = vector.broadcast %12 : vector<1x8xf32> to vector<16x8xf32>
    %14 = arith.addf %10, %13 : vector<16x8xf32>
    %c0_14 = arith.constant 0 : index
    %c0_15 = arith.constant 0 : index
    %c0_16 = arith.constant 0 : index
    %c0_17 = arith.constant 0 : index
    %15 = vector.load %arg5[%c0_14, %c0_15, %c0_16, %c0_17] : memref<1x4x32x8xf32, #tpu.memory_space<vmem>>, vector<1x1x32x8xf32>
    %16 = vector.shape_cast %15 : vector<1x1x32x8xf32> to vector<32x8xf32>
    %cst_18 = arith.constant dense<0.000000e+00> : vector<16x8xf32>
    %17 = tpu.matmul %3, %16, %cst_18 {dimension_numbers = #tpu.dot_dimension_numbers<[1], [0], [0], [1], [0, 0, 1, 1], [], []>} : vector<16x32xf32>, vector<32x8xf32>, vector<16x8xf32> -> vector<16x8xf32>
    %c0_19 = arith.constant 0 : index
    %c0_20 = arith.constant 0 : index
    %c0_21 = arith.constant 0 : index
    %c0_22 = arith.constant 0 : index
    %18 = vector.load %arg6[%c0_19, %c0_20, %c0_21, %c0_22] : memref<1x4x1x8xf32, #tpu.memory_space<vmem>>, vector<1x1x1x8xf32>
    %19 = vector.shape_cast %18 : vector<1x1x1x8xf32> to vector<1x8xf32>
    %20 = vector.broadcast %19 : vector<1x8xf32> to vector<16x8xf32>
    %21 = arith.addf %17, %20 : vector<16x8xf32>
    %c0_23 = arith.constant 0 : index
    %c0_24 = arith.constant 0 : index
    %c0_25 = arith.constant 0 : index
    %c0_26 = arith.constant 0 : index
    %22 = vector.load %arg7[%c0_23, %c0_24, %c0_25, %c0_26] : memref<1x4x32x8xf32, #tpu.memory_space<vmem>>, vector<1x1x32x8xf32>
    %23 = vector.shape_cast %22 : vector<1x1x32x8xf32> to vector<32x8xf32>
    %cst_27 = arith.constant dense<0.000000e+00> : vector<16x8xf32>
    %24 = tpu.matmul %3, %23, %cst_27 {dimension_numbers = #tpu.dot_dimension_numbers<[1], [0], [0], [1], [0, 0, 1, 1], [], []>} : vector<16x32xf32>, vector<32x8xf32>, vector<16x8xf32> -> vector<16x8xf32>
    %c0_28 = arith.constant 0 : index
    %c0_29 = arith.constant 0 : index
    %c0_30 = arith.constant 0 : index
    %c0_31 = arith.constant 0 : index
    %25 = vector.load %arg8[%c0_28, %c0_29, %c0_30, %c0_31] : memref<1x4x1x8xf32, #tpu.memory_space<vmem>>, vector<1x1x1x8xf32>
    %26 = vector.shape_cast %25 : vector<1x1x1x8xf32> to vector<1x8xf32>
    %27 = vector.broadcast %26 : vector<1x8xf32> to vector<16x8xf32>
    %28 = arith.addf %24, %27 : vector<16x8xf32>
    %29 = vector.shape_cast %14 : vector<16x8xf32> to vector<2x8x8xf32>
    %30 = vector.shape_cast %21 : vector<16x8xf32> to vector<2x8x8xf32>
    %31 = vector.shape_cast %28 : vector<16x8xf32> to vector<2x8x8xf32>
    "tpu.trace_start"() <{level = 10 : i32, message = "bqd,bkd->bqk"}> : () -> ()
    %cst_32 = arith.constant dense<0.000000e+00> : vector<2x8x8xf32>
    %32 = tpu.matmul %29, %30, %cst_32 {dimension_numbers = #tpu.dot_dimension_numbers<[2], [2], [1], [1], [0, 0, 0, 1, 1, 1], [0], [0]>} : vector<2x8x8xf32>, vector<2x8x8xf32>, vector<2x8x8xf32> -> vector<2x8x8xf32>
    "tpu.trace_stop"() : () -> ()
    %cst_33 = arith.constant 0.353553385 : f32
    %33 = vector.broadcast %cst_33 : f32 to vector<2x8x8xf32>
    %34 = arith.mulf %32, %33 : vector<2x8x8xf32>
    %35 = vector.shape_cast %6 : vector<2x8xi1> to vector<2x1x8xi1>
    %cst_34 = arith.constant -1.000000e+09 : f32
    %36 = vector.shape_cast %35 : vector<2x1x8xi1> to vector<2x1x8xi1>
    %37 = vector.broadcast %36 : vector<2x1x8xi1> to vector<2x8x8xi1>
    %38 = vector.broadcast %cst_34 : f32 to vector<2x8x8xf32>
    %39 = arith.select %37, %38, %34 : vector<2x8x8xi1>, vector<2x8x8xf32>
    %cst_35 = arith.constant dense<0xFF800000> : vector<2x8xf32>
    %40 = vector.multi_reduction <maximumf>, %39, %cst_35 [2] : vector<2x8x8xf32> to vector<2x8xf32>
    %cst_36 = arith.constant 0xFF800000 : f32
    %41 = vector.broadcast %cst_36 : f32 to vector<2x8xf32>
    %42 = arith.maximumf %41, %40 : vector<2x8xf32>
    %43 = vector.shape_cast %42 : vector<2x8xf32> to vector<2x8x1xf32>
    %44 = vector.broadcast %43 : vector<2x8x1xf32> to vector<2x8x8xf32>
    %45 = arith.subf %39, %44 : vector<2x8x8xf32>
    %46 = math.exp %45 : vector<2x8x8xf32>
    %cst_37 = arith.constant dense<0.000000e+00> : vector<2x8xf32>
    %47 = vector.multi_reduction <add>, %46, %cst_37 [2] : vector<2x8x8xf32> to vector<2x8xf32>
    %48 = vector.shape_cast %47 : vector<2x8xf32> to vector<2x8x1xf32>
    %49 = vector.broadcast %48 : vector<2x8x1xf32> to vector<2x8x8xf32>
    %50 = arith.divf %46, %49 : vector<2x8x8xf32>
    %c0_38 = arith.constant 0 : index
    %c0_39 = arith.constant 0 : index
    %c0_40 = arith.constant 0 : index
    %c0_41 = arith.constant 0 : index
    %51 = vector.load %arg20[%c0_38, %c0_39, %c0_40, %c0_41] : memref<1x8x8x8xf32, #tpu.memory_space<vmem>>, vector<1x2x8x8xf32>
    %52 = vector.shape_cast %51 : vector<1x2x8x8xf32> to vector<2x8x8xf32>
    %53 = vector.shape_cast %50 : vector<2x8x8xf32> to vector<1x2x8x8xf32>
    tpu.vector_store %arg20[%c0_38, %c0_39, %c0_40, %c0_41], %53 {strides = array<i32>} : memref<1x8x8x8xf32, #tpu.memory_space<vmem>>, vector<1x2x8x8xf32>,
    "tpu.trace_start"() <{level = 10 : i32, message = "bqk,bkd->bqd"}> : () -> ()
    %cst_42 = arith.constant dense<0.000000e+00> : vector<2x8x8xf32>
    %54 = tpu.matmul %50, %31, %cst_42 {dimension_numbers = #tpu.dot_dimension_numbers<[2], [1], [1], [2], [0, 0, 0, 1, 1, 2], [0], [0]>} : vector<2x8x8xf32>, vector<2x8x8xf32>, vector<2x8x8xf32> -> vector<2x8x8xf32>
    "tpu.trace_stop"() : () -> ()
    %55 = vector.shape_cast %54 : vector<2x8x8xf32> to vector<16x8xf32>
    %c0_43 = arith.constant 0 : index
    %c0_44 = arith.constant 0 : index
    %c0_45 = arith.constant 0 : index
    %c0_46 = arith.constant 0 : index
    %56 = vector.load %arg9[%c0_43, %c0_44, %c0_45, %c0_46] : memref<1x4x8x32xf32, #tpu.memory_space<vmem>>, vector<1x1x8x32xf32>
    %57 = vector.shape_cast %56 : vector<1x1x8x32xf32> to vector<8x32xf32>
    %cst_47 = arith.constant dense<0.000000e+00> : vector<16x32xf32>
    %58 = tpu.matmul %55, %57, %cst_47 {dimension_numbers = #tpu.dot_dimension_numbers<[1], [0], [0], [1], [0, 0, 1, 1], [], []>} : vector<16x8xf32>, vector<8x32xf32>, vector<16x32xf32> -> vector<16x32xf32>
    %59 = arith.addf %7, %58 : vector<16x32xf32>
    %c0_48 = arith.constant 0 : index
    %c1 = arith.constant 1 : index
    %c0_49 = arith.constant 0 : index
    %c0_50 = arith.constant 0 : index
    %60 = vector.load %arg3[%c0_48, %c1, %c0_49, %c0_50] : memref<1x4x32x8xf32, #tpu.memory_space<vmem>>, vector<1x1x32x8xf32>
    %61 = vector.shape_cast %60 : vector<1x1x32x8xf32> to vector<32x8xf32>
    %cst_51 = arith.constant dense<0.000000e+00> : vector<16x8xf32>
    %62 = tpu.matmul %3, %61, %cst_51 {dimension_numbers = #tpu.dot_dimension_numbers<[1], [0], [0], [1], [0, 0, 1, 1], [], []>} : vector<16x32xf32>, vector<32x8xf32>, vector<16x8xf32> -> vector<16x8xf32>
    %c0_52 = arith.constant 0 : index
    %c1_53 = arith.constant 1 : index
    %c0_54 = arith.constant 0 : index
    %c0_55 = arith.constant 0 : index
    %63 = vector.load %arg4[%c0_52, %c1_53, %c0_54, %c0_55] : memref<1x4x1x8xf32, #tpu.memory_space<vmem>>, vector<1x1x1x8xf32>
    %64 = vector.shape_cast %63 : vector<1x1x1x8xf32> to vector<1x8xf32>
    %65 = vector.broadcast %64 : vector<1x8xf32> to vector<16x8xf32>
    %66 = arith.addf %62, %65 : vector<16x8xf32>
    %c0_56 = arith.constant 0 : index
    %c1_57 = arith.constant 1 : index
    %c0_58 = arith.constant 0 : index
    %c0_59 = arith.constant 0 : index
    %67 = vector.load %arg5[%c0_56, %c1_57, %c0_58, %c0_59] : memref<1x4x32x8xf32, #tpu.memory_space<vmem>>, vector<1x1x32x8xf32>
    %68 = vector.shape_cast %67 : vector<1x1x32x8xf32> to vector<32x8xf32>
    %cst_60 = arith.constant dense<0.000000e+00> : vector<16x8xf32>
    %69 = tpu.matmul %3, %68, %cst_60 {dimension_numbers = #tpu.dot_dimension_numbers<[1], [0], [0], [1], [0, 0, 1, 1], [], []>} : vector<16x32xf32>, vector<32x8xf32>, vector<16x8xf32> -> vector<16x8xf32>
    %c0_61 = arith.constant 0 : index
    %c1_62 = arith.constant 1 : index
    %c0_63 = arith.constant 0 : index
    %c0_64 = arith.constant 0 : index
    %70 = vector.load %arg6[%c0_61, %c1_62, %c0_63, %c0_64] : memref<1x4x1x8xf32, #tpu.memory_space<vmem>>, vector<1x1x1x8xf32>
    %71 = vector.shape_cast %70 : vector<1x1x1x8xf32> to vector<1x8xf32>
    %72 = vector.broadcast %71 : vector<1x8xf32> to vector<16x8xf32>
    %73 = arith.addf %69, %72 : vector<16x8xf32>
    %c0_65 = arith.constant 0 : index
    %c1_66 = arith.constant 1 : index
    %c0_67 = arith.constant 0 : index
    %c0_68 = arith.constant 0 : index
    %74 = vector.load %arg7[%c0_65, %c1_66, %c0_67, %c0_68] : memref<1x4x32x8xf32, #tpu.memory_space<vmem>>, vector<1x1x32x8xf32>
    %75 = vector.shape_cast %74 : vector<1x1x32x8xf32> to vector<32x8xf32>
    %cst_69 = arith.constant dense<0.000000e+00> : vector<16x8xf32>
    %76 = tpu.matmul %3, %75, %cst_69 {dimension_numbers = #tpu.dot_dimension_numbers<[1], [0], [0], [1], [0, 0, 1, 1], [], []>} : vector<16x32xf32>, vector<32x8xf32>, vector<16x8xf32> -> vector<16x8xf32>
    %c0_70 = arith.constant 0 : index
    %c1_71 = arith.constant 1 : index
    %c0_72 = arith.constant 0 : index
    %c0_73 = arith.constant 0 : index
    %77 = vector.load %arg8[%c0_70, %c1_71, %c0_72, %c0_73] : memref<1x4x1x8xf32, #tpu.memory_space<vmem>>, vector<1x1x1x8xf32>
    %78 = vector.shape_cast %77 : vector<1x1x1x8xf32> to vector<1x8xf32>
    %79 = vector.broadcast %78 : vector<1x8xf32> to vector<16x8xf32>
    %80 = arith.addf %76, %79 : vector<16x8xf32>
    %81 = vector.shape_cast %66 : vector<16x8xf32> to vector<2x8x8xf32>
    %82 = vector.shape_cast %73 : vector<16x8xf32> to vector<2x8x8xf32>
    %83 = vector.shape_cast %80 : vector<16x8xf32> to vector<2x8x8xf32>
    "tpu.trace_start"() <{level = 10 : i32, message = "bqd,bkd->bqk"}> : () -> ()
    %cst_74 = arith.constant dense<0.000000e+00> : vector<2x8x8xf32>
    %84 = tpu.matmul %81, %82, %cst_74 {dimension_numbers = #tpu.dot_dimension_numbers<[2], [2], [1], [1], [0, 0, 0, 1, 1, 1], [0], [0]>} : vector<2x8x8xf32>, vector<2x8x8xf32>, vector<2x8x8xf32> -> vector<2x8x8xf32>
    "tpu.trace_stop"() : () -> ()
    %cst_75 = arith.constant 0.353553385 : f32
    %85 = vector.broadcast %cst_75 : f32 to vector<2x8x8xf32>
    %86 = arith.mulf %84, %85 : vector<2x8x8xf32>
    %87 = vector.shape_cast %6 : vector<2x8xi1> to vector<2x1x8xi1>
    %cst_76 = arith.constant -1.000000e+09 : f32
    %88 = vector.shape_cast %87 : vector<2x1x8xi1> to vector<2x1x8xi1>
    %89 = vector.broadcast %88 : vector<2x1x8xi1> to vector<2x8x8xi1>
    %90 = vector.broadcast %cst_76 : f32 to vector<2x8x8xf32>
    %91 = arith.select %89, %90, %86 : vector<2x8x8xi1>, vector<2x8x8xf32>
    %cst_77 = arith.constant dense<0xFF800000> : vector<2x8xf32>
    %92 = vector.multi_reduction <maximumf>, %91, %cst_77 [2] : vector<2x8x8xf32> to vector<2x8xf32>
    %cst_78 = arith.constant 0xFF800000 : f32
    %93 = vector.broadcast %cst_78 : f32 to vector<2x8xf32>
    %94 = arith.maximumf %93, %92 : vector<2x8xf32>
    %95 = vector.shape_cast %94 : vector<2x8xf32> to vector<2x8x1xf32>
    %96 = vector.broadcast %95 : vector<2x8x1xf32> to vector<2x8x8xf32>
    %97 = arith.subf %91, %96 : vector<2x8x8xf32>
    %98 = math.exp %97 : vector<2x8x8xf32>
    %cst_79 = arith.constant dense<0.000000e+00> : vector<2x8xf32>
    %99 = vector.multi_reduction <add>, %98, %cst_79 [2] : vector<2x8x8xf32> to vector<2x8xf32>
    %100 = vector.shape_cast %99 : vector<2x8xf32> to vector<2x8x1xf32>
    %101 = vector.broadcast %100 : vector<2x8x1xf32> to vector<2x8x8xf32>
    %102 = arith.divf %98, %101 : vector<2x8x8xf32>
    %c0_80 = arith.constant 0 : index
    %c2 = arith.constant 2 : index
    %c0_81 = arith.constant 0 : index
    %c0_82 = arith.constant 0 : index
    %103 = vector.load %arg20[%c0_80, %c2, %c0_81, %c0_82] : memref<1x8x8x8xf32, #tpu.memory_space<vmem>>, vector<1x2x8x8xf32>
    %104 = vector.shape_cast %103 : vector<1x2x8x8xf32> to vector<2x8x8xf32>
    %105 = vector.shape_cast %102 : vector<2x8x8xf32> to vector<1x2x8x8xf32>
    tpu.vector_store %arg20[%c0_80, %c2, %c0_81, %c0_82], %105 {strides = array<i32>} : memref<1x8x8x8xf32, #tpu.memory_space<vmem>>, vector<1x2x8x8xf32>,
    "tpu.trace_start"() <{level = 10 : i32, message = "bqk,bkd->bqd"}> : () -> ()
    %cst_83 = arith.constant dense<0.000000e+00> : vector<2x8x8xf32>
    %106 = tpu.matmul %102, %83, %cst_83 {dimension_numbers = #tpu.dot_dimension_numbers<[2], [1], [1], [2], [0, 0, 0, 1, 1, 2], [0], [0]>} : vector<2x8x8xf32>, vector<2x8x8xf32>, vector<2x8x8xf32> -> vector<2x8x8xf32>
    "tpu.trace_stop"() : () -> ()
    %107 = vector.shape_cast %106 : vector<2x8x8xf32> to vector<16x8xf32>
    %c0_84 = arith.constant 0 : index
    %c1_85 = arith.constant 1 : index
    %c0_86 = arith.constant 0 : index
    %c0_87 = arith.constant 0 : index
    %108 = vector.load %arg9[%c0_84, %c1_85, %c0_86, %c0_87] : memref<1x4x8x32xf32, #tpu.memory_space<vmem>>, vector<1x1x8x32xf32>
    %109 = vector.shape_cast %108 : vector<1x1x8x32xf32> to vector<8x32xf32>
    %cst_88 = arith.constant dense<0.000000e+00> : vector<16x32xf32>
    %110 = tpu.matmul %107, %109, %cst_88 {dimension_numbers = #tpu.dot_dimension_numbers<[1], [0], [0], [1], [0, 0, 1, 1], [], []>} : vector<16x8xf32>, vector<8x32xf32>, vector<16x32xf32> -> vector<16x32xf32>
    %111 = arith.addf %59, %110 : vector<16x32xf32>
    %c0_89 = arith.constant 0 : index
    %c2_90 = arith.constant 2 : index
    %c0_91 = arith.constant 0 : index
    %c0_92 = arith.constant 0 : index
    %112 = vector.load %arg3[%c0_89, %c2_90, %c0_91, %c0_92] : memref<1x4x32x8xf32, #tpu.memory_space<vmem>>, vector<1x1x32x8xf32>
    %113 = vector.shape_cast %112 : vector<1x1x32x8xf32> to vector<32x8xf32>
    %cst_93 = arith.constant dense<0.000000e+00> : vector<16x8xf32>
    %114 = tpu.matmul %3, %113, %cst_93 {dimension_numbers = #tpu.dot_dimension_numbers<[1], [0], [0], [1], [0, 0, 1, 1], [], []>} : vector<16x32xf32>, vector<32x8xf32>, vector<16x8xf32> -> vector<16x8xf32>
    %c0_94 = arith.constant 0 : index
    %c2_95 = arith.constant 2 : index
    %c0_96 = arith.constant 0 : index
    %c0_97 = arith.constant 0 : index
    %115 = vector.load %arg4[%c0_94, %c2_95, %c0_96, %c0_97] : memref<1x4x1x8xf32, #tpu.memory_space<vmem>>, vector<1x1x1x8xf32>
    %116 = vector.shape_cast %115 : vector<1x1x1x8xf32> to vector<1x8xf32>
    %117 = vector.broadcast %116 : vector<1x8xf32> to vector<16x8xf32>
    %118 = arith.addf %114, %117 : vector<16x8xf32>
    %c0_98 = arith.constant 0 : index
    %c2_99 = arith.constant 2 : index
    %c0_100 = arith.constant 0 : index
    %c0_101 = arith.constant 0 : index
    %119 = vector.load %arg5[%c0_98, %c2_99, %c0_100, %c0_101] : memref<1x4x32x8xf32, #tpu.memory_space<vmem>>, vector<1x1x32x8xf32>
    %120 = vector.shape_cast %119 : vector<1x1x32x8xf32> to vector<32x8xf32>
    %cst_102 = arith.constant dense<0.000000e+00> : vector<16x8xf32>
    %121 = tpu.matmul %3, %120, %cst_102 {dimension_numbers = #tpu.dot_dimension_numbers<[1], [0], [0], [1], [0, 0, 1, 1], [], []>} : vector<16x32xf32>, vector<32x8xf32>, vector<16x8xf32> -> vector<16x8xf32>
    %c0_103 = arith.constant 0 : index
    %c2_104 = arith.constant 2 : index
    %c0_105 = arith.constant 0 : index
    %c0_106 = arith.constant 0 : index
    %122 = vector.load %arg6[%c0_103, %c2_104, %c0_105, %c0_106] : memref<1x4x1x8xf32, #tpu.memory_space<vmem>>, vector<1x1x1x8xf32>
    %123 = vector.shape_cast %122 : vector<1x1x1x8xf32> to vector<1x8xf32>
    %124 = vector.broadcast %123 : vector<1x8xf32> to vector<16x8xf32>
    %125 = arith.addf %121, %124 : vector<16x8xf32>
    %c0_107 = arith.constant 0 : index
    %c2_108 = arith.constant 2 : index
    %c0_109 = arith.constant 0 : index
    %c0_110 = arith.constant 0 : index
    %126 = vector.load %arg7[%c0_107, %c2_108, %c0_109, %c0_110] : memref<1x4x32x8xf32, #tpu.memory_space<vmem>>, vector<1x1x32x8xf32>
    %127 = vector.shape_cast %126 : vector<1x1x32x8xf32> to vector<32x8xf32>
    %cst_111 = arith.constant dense<0.000000e+00> : vector<16x8xf32>
    %128 = tpu.matmul %3, %127, %cst_111 {dimension_numbers = #tpu.dot_dimension_numbers<[1], [0], [0], [1], [0, 0, 1, 1], [], []>} : vector<16x32xf32>, vector<32x8xf32>, vector<16x8xf32> -> vector<16x8xf32>
    %c0_112 = arith.constant 0 : index
    %c2_113 = arith.constant 2 : index
    %c0_114 = arith.constant 0 : index
    %c0_115 = arith.constant 0 : index
    %129 = vector.load %arg8[%c0_112, %c2_113, %c0_114, %c0_115] : memref<1x4x1x8xf32, #tpu.memory_space<vmem>>, vector<1x1x1x8xf32>
    %130 = vector.shape_cast %129 : vector<1x1x1x8xf32> to vector<1x8xf32>
    %131 = vector.broadcast %130 : vector<1x8xf32> to vector<16x8xf32>
    %132 = arith.addf %128, %131 : vector<16x8xf32>
    %133 = vector.shape_cast %118 : vector<16x8xf32> to vector<2x8x8xf32>
    %134 = vector.shape_cast %125 : vector<16x8xf32> to vector<2x8x8xf32>
    %135 = vector.shape_cast %132 : vector<16x8xf32> to vector<2x8x8xf32>
    "tpu.trace_start"() <{level = 10 : i32, message = "bqd,bkd->bqk"}> : () -> ()
    %cst_116 = arith.constant dense<0.000000e+00> : vector<2x8x8xf32>
    %136 = tpu.matmul %133, %134, %cst_116 {dimension_numbers = #tpu.dot_dimension_numbers<[2], [2], [1], [1], [0, 0, 0, 1, 1, 1], [0], [0]>} : vector<2x8x8xf32>, vector<2x8x8xf32>, vector<2x8x8xf32> -> vector<2x8x8xf32>
    "tpu.trace_stop"() : () -> ()
    %cst_117 = arith.constant 0.353553385 : f32
    %137 = vector.broadcast %cst_117 : f32 to vector<2x8x8xf32>
    %138 = arith.mulf %136, %137 : vector<2x8x8xf32>
    %139 = vector.shape_cast %6 : vector<2x8xi1> to vector<2x1x8xi1>
    %cst_118 = arith.constant -1.000000e+09 : f32
    %140 = vector.shape_cast %139 : vector<2x1x8xi1> to vector<2x1x8xi1>
    %141 = vector.broadcast %140 : vector<2x1x8xi1> to vector<2x8x8xi1>
    %142 = vector.broadcast %cst_118 : f32 to vector<2x8x8xf32>
    %143 = arith.select %141, %142, %138 : vector<2x8x8xi1>, vector<2x8x8xf32>
    %cst_119 = arith.constant dense<0xFF800000> : vector<2x8xf32>
    %144 = vector.multi_reduction <maximumf>, %143, %cst_119 [2] : vector<2x8x8xf32> to vector<2x8xf32>
    %cst_120 = arith.constant 0xFF800000 : f32
    %145 = vector.broadcast %cst_120 : f32 to vector<2x8xf32>
    %146 = arith.maximumf %145, %144 : vector<2x8xf32>
    %147 = vector.shape_cast %146 : vector<2x8xf32> to vector<2x8x1xf32>
    %148 = vector.broadcast %147 : vector<2x8x1xf32> to vector<2x8x8xf32>
    %149 = arith.subf %143, %148 : vector<2x8x8xf32>
    %150 = math.exp %149 : vector<2x8x8xf32>
    %cst_121 = arith.constant dense<0.000000e+00> : vector<2x8xf32>
    %151 = vector.multi_reduction <add>, %150, %cst_121 [2] : vector<2x8x8xf32> to vector<2x8xf32>
    %152 = vector.shape_cast %151 : vector<2x8xf32> to vector<2x8x1xf32>
    %153 = vector.broadcast %152 : vector<2x8x1xf32> to vector<2x8x8xf32>
    %154 = arith.divf %150, %153 : vector<2x8x8xf32>
    %c0_122 = arith.constant 0 : index
    %c4 = arith.constant 4 : index
    %c0_123 = arith.constant 0 : index
    %c0_124 = arith.constant 0 : index
    %155 = vector.load %arg20[%c0_122, %c4, %c0_123, %c0_124] : memref<1x8x8x8xf32, #tpu.memory_space<vmem>>, vector<1x2x8x8xf32>
    %156 = vector.shape_cast %155 : vector<1x2x8x8xf32> to vector<2x8x8xf32>
    %157 = vector.shape_cast %154 : vector<2x8x8xf32> to vector<1x2x8x8xf32>
    tpu.vector_store %arg20[%c0_122, %c4, %c0_123, %c0_124], %157 {strides = array<i32>} : memref<1x8x8x8xf32, #tpu.memory_space<vmem>>, vector<1x2x8x8xf32>,
    "tpu.trace_start"() <{level = 10 : i32, message = "bqk,bkd->bqd"}> : () -> ()
    %cst_125 = arith.constant dense<0.000000e+00> : vector<2x8x8xf32>
    %158 = tpu.matmul %154, %135, %cst_125 {dimension_numbers = #tpu.dot_dimension_numbers<[2], [1], [1], [2], [0, 0, 0, 1, 1, 2], [0], [0]>} : vector<2x8x8xf32>, vector<2x8x8xf32>, vector<2x8x8xf32> -> vector<2x8x8xf32>
    "tpu.trace_stop"() : () -> ()
    %159 = vector.shape_cast %158 : vector<2x8x8xf32> to vector<16x8xf32>
    %c0_126 = arith.constant 0 : index
    %c2_127 = arith.constant 2 : index
    %c0_128 = arith.constant 0 : index
    %c0_129 = arith.constant 0 : index
    %160 = vector.load %arg9[%c0_126, %c2_127, %c0_128, %c0_129] : memref<1x4x8x32xf32, #tpu.memory_space<vmem>>, vector<1x1x8x32xf32>
    %161 = vector.shape_cast %160 : vector<1x1x8x32xf32> to vector<8x32xf32>
    %cst_130 = arith.constant dense<0.000000e+00> : vector<16x32xf32>
    %162 = tpu.matmul %159, %161, %cst_130 {dimension_numbers = #tpu.dot_dimension_numbers<[1], [0], [0], [1], [0, 0, 1, 1], [], []>} : vector<16x8xf32>, vector<8x32xf32>, vector<16x32xf32> -> vector<16x32xf32>
    %163 = arith.addf %111, %162 : vector<16x32xf32>
    %c0_131 = arith.constant 0 : index
    %c3 = arith.constant 3 : index
    %c0_132 = arith.constant 0 : index
    %c0_133 = arith.constant 0 : index
    %164 = vector.load %arg3[%c0_131, %c3, %c0_132, %c0_133] : memref<1x4x32x8xf32, #tpu.memory_space<vmem>>, vector<1x1x32x8xf32>
    %165 = vector.shape_cast %164 : vector<1x1x32x8xf32> to vector<32x8xf32>
    %cst_134 = arith.constant dense<0.000000e+00> : vector<16x8xf32>
    %166 = tpu.matmul %3, %165, %cst_134 {dimension_numbers = #tpu.dot_dimension_numbers<[1], [0], [0], [1], [0, 0, 1, 1], [], []>} : vector<16x32xf32>, vector<32x8xf32>, vector<16x8xf32> -> vector<16x8xf32>
    %c0_135 = arith.constant 0 : index
    %c3_136 = arith.constant 3 : index
    %c0_137 = arith.constant 0 : index
    %c0_138 = arith.constant 0 : index
    %167 = vector.load %arg4[%c0_135, %c3_136, %c0_137, %c0_138] : memref<1x4x1x8xf32, #tpu.memory_space<vmem>>, vector<1x1x1x8xf32>
    %168 = vector.shape_cast %167 : vector<1x1x1x8xf32> to vector<1x8xf32>
    %169 = vector.broadcast %168 : vector<1x8xf32> to vector<16x8xf32>
    %170 = arith.addf %166, %169 : vector<16x8xf32>
    %c0_139 = arith.constant 0 : index
    %c3_140 = arith.constant 3 : index
    %c0_141 = arith.constant 0 : index
    %c0_142 = arith.constant 0 : index
    %171 = vector.load %arg5[%c0_139, %c3_140, %c0_141, %c0_142] : memref<1x4x32x8xf32, #tpu.memory_space<vmem>>, vector<1x1x32x8xf32>
    %172 = vector.shape_cast %171 : vector<1x1x32x8xf32> to vector<32x8xf32>
    %cst_143 = arith.constant dense<0.000000e+00> : vector<16x8xf32>
    %173 = tpu.matmul %3, %172, %cst_143 {dimension_numbers = #tpu.dot_dimension_numbers<[1], [0], [0], [1], [0, 0, 1, 1], [], []>} : vector<16x32xf32>, vector<32x8xf32>, vector<16x8xf32> -> vector<16x8xf32>
    %c0_144 = arith.constant 0 : index
    %c3_145 = arith.constant 3 : index
    %c0_146 = arith.constant 0 : index
    %c0_147 = arith.constant 0 : index
    %174 = vector.load %arg6[%c0_144, %c3_145, %c0_146, %c0_147] : memref<1x4x1x8xf32, #tpu.memory_space<vmem>>, vector<1x1x1x8xf32>
    %175 = vector.shape_cast %174 : vector<1x1x1x8xf32> to vector<1x8xf32>
    %176 = vector.broadcast %175 : vector<1x8xf32> to vector<16x8xf32>
    %177 = arith.addf %173, %176 : vector<16x8xf32>
    %c0_148 = arith.constant 0 : index
    %c3_149 = arith.constant 3 : index
    %c0_150 = arith.constant 0 : index
    %c0_151 = arith.constant 0 : index
    %178 = vector.load %arg7[%c0_148, %c3_149, %c0_150, %c0_151] : memref<1x4x32x8xf32, #tpu.memory_space<vmem>>, vector<1x1x32x8xf32>
    %179 = vector.shape_cast %178 : vector<1x1x32x8xf32> to vector<32x8xf32>
    %cst_152 = arith.constant dense<0.000000e+00> : vector<16x8xf32>
    %180 = tpu.matmul %3, %179, %cst_152 {dimension_numbers = #tpu.dot_dimension_numbers<[1], [0], [0], [1], [0, 0, 1, 1], [], []>} : vector<16x32xf32>, vector<32x8xf32>, vector<16x8xf32> -> vector<16x8xf32>
    %c0_153 = arith.constant 0 : index
    %c3_154 = arith.constant 3 : index
    %c0_155 = arith.constant 0 : index
    %c0_156 = arith.constant 0 : index
    %181 = vector.load %arg8[%c0_153, %c3_154, %c0_155, %c0_156] : memref<1x4x1x8xf32, #tpu.memory_space<vmem>>, vector<1x1x1x8xf32>
    %182 = vector.shape_cast %181 : vector<1x1x1x8xf32> to vector<1x8xf32>
    %183 = vector.broadcast %182 : vector<1x8xf32> to vector<16x8xf32>
    %184 = arith.addf %180, %183 : vector<16x8xf32>
    %185 = vector.shape_cast %170 : vector<16x8xf32> to vector<2x8x8xf32>
    %186 = vector.shape_cast %177 : vector<16x8xf32> to vector<2x8x8xf32>
    %187 = vector.shape_cast %184 : vector<16x8xf32> to vector<2x8x8xf32>
    "tpu.trace_start"() <{level = 10 : i32, message = "bqd,bkd->bqk"}> : () -> ()
    %cst_157 = arith.constant dense<0.000000e+00> : vector<2x8x8xf32>
    %188 = tpu.matmul %185, %186, %cst_157 {dimension_numbers = #tpu.dot_dimension_numbers<[2], [2], [1], [1], [0, 0, 0, 1, 1, 1], [0], [0]>} : vector<2x8x8xf32>, vector<2x8x8xf32>, vector<2x8x8xf32> -> vector<2x8x8xf32>
    "tpu.trace_stop"() : () -> ()
    %cst_158 = arith.constant 0.353553385 : f32
    %189 = vector.broadcast %cst_158 : f32 to vector<2x8x8xf32>
    %190 = arith.mulf %188, %189 : vector<2x8x8xf32>
    %191 = vector.shape_cast %6 : vector<2x8xi1> to vector<2x1x8xi1>
    %cst_159 = arith.constant -1.000000e+09 : f32
    %192 = vector.shape_cast %191 : vector<2x1x8xi1> to vector<2x1x8xi1>
    %193 = vector.broadcast %192 : vector<2x1x8xi1> to vector<2x8x8xi1>
    %194 = vector.broadcast %cst_159 : f32 to vector<2x8x8xf32>
    %195 = arith.select %193, %194, %190 : vector<2x8x8xi1>, vector<2x8x8xf32>
    %cst_160 = arith.constant dense<0xFF800000> : vector<2x8xf32>
    %196 = vector.multi_reduction <maximumf>, %195, %cst_160 [2] : vector<2x8x8xf32> to vector<2x8xf32>
    %cst_161 = arith.constant 0xFF800000 : f32
    %197 = vector.broadcast %cst_161 : f32 to vector<2x8xf32>
    %198 = arith.maximumf %197, %196 : vector<2x8xf32>
    %199 = vector.shape_cast %198 : vector<2x8xf32> to vector<2x8x1xf32>
    %200 = vector.broadcast %199 : vector<2x8x1xf32> to vector<2x8x8xf32>
    %201 = arith.subf %195, %200 : vector<2x8x8xf32>
    %202 = math.exp %201 : vector<2x8x8xf32>
    %cst_162 = arith.constant dense<0.000000e+00> : vector<2x8xf32>
    %203 = vector.multi_reduction <add>, %202, %cst_162 [2] : vector<2x8x8xf32> to vector<2x8xf32>
    %204 = vector.shape_cast %203 : vector<2x8xf32> to vector<2x8x1xf32>
    %205 = vector.broadcast %204 : vector<2x8x1xf32> to vector<2x8x8xf32>
    %206 = arith.divf %202, %205 : vector<2x8x8xf32>
    %c0_163 = arith.constant 0 : index
    %c6 = arith.constant 6 : index
    %c0_164 = arith.constant 0 : index
    %c0_165 = arith.constant 0 : index
    %207 = vector.load %arg20[%c0_163, %c6, %c0_164, %c0_165] : memref<1x8x8x8xf32, #tpu.memory_space<vmem>>, vector<1x2x8x8xf32>
    %208 = vector.shape_cast %207 : vector<1x2x8x8xf32> to vector<2x8x8xf32>
    %209 = vector.shape_cast %206 : vector<2x8x8xf32> to vector<1x2x8x8xf32>
    tpu.vector_store %arg20[%c0_163, %c6, %c0_164, %c0_165], %209 {strides = array<i32>} : memref<1x8x8x8xf32, #tpu.memory_space<vmem>>, vector<1x2x8x8xf32>,
    "tpu.trace_start"() <{level = 10 : i32, message = "bqk,bkd->bqd"}> : () -> ()
    %cst_166 = arith.constant dense<0.000000e+00> : vector<2x8x8xf32>
    %210 = tpu.matmul %206, %187, %cst_166 {dimension_numbers = #tpu.dot_dimension_numbers<[2], [1], [1], [2], [0, 0, 0, 1, 1, 2], [0], [0]>} : vector<2x8x8xf32>, vector<2x8x8xf32>, vector<2x8x8xf32> -> vector<2x8x8xf32>
    "tpu.trace_stop"() : () -> ()
    %211 = vector.shape_cast %210 : vector<2x8x8xf32> to vector<16x8xf32>
    %c0_167 = arith.constant 0 : index
    %c3_168 = arith.constant 3 : index
    %c0_169 = arith.constant 0 : index
    %c0_170 = arith.constant 0 : index
    %212 = vector.load %arg9[%c0_167, %c3_168, %c0_169, %c0_170] : memref<1x4x8x32xf32, #tpu.memory_space<vmem>>, vector<1x1x8x32xf32>
    %213 = vector.shape_cast %212 : vector<1x1x8x32xf32> to vector<8x32xf32>
    %cst_171 = arith.constant dense<0.000000e+00> : vector<16x32xf32>
    %214 = tpu.matmul %211, %213, %cst_171 {dimension_numbers = #tpu.dot_dimension_numbers<[1], [0], [0], [1], [0, 0, 1, 1], [], []>} : vector<16x8xf32>, vector<8x32xf32>, vector<16x32xf32> -> vector<16x32xf32>
    %215 = arith.addf %163, %214 : vector<16x32xf32>
    %c0_172 = arith.constant 0 : index
    %c0_173 = arith.constant 0 : index
    %c0_174 = arith.constant 0 : index
    %216 = vector.load %arg10[%c0_172, %c0_173, %c0_174] : memref<1x1x32xf32, #tpu.memory_space<vmem>>, vector<1x1x32xf32>
    %217 = vector.shape_cast %216 : vector<1x1x32xf32> to vector<1x32xf32>
    %218 = vector.broadcast %217 : vector<1x32xf32> to vector<16x32xf32>
    %219 = arith.addf %215, %218 : vector<16x32xf32>
    %220 = arith.addf %3, %219 : vector<16x32xf32>
    %cst_175 = arith.constant dense<0.000000e+00> : vector<16xf32>
    %221 = vector.multi_reduction <add>, %220, %cst_175 [1] : vector<16x32xf32> to vector<16xf32>
    %222 = vector.shape_cast %221 : vector<16xf32> to vector<16x1xf32>
    %cst_176 = arith.constant 3.200000e+01 : f32
    %223 = vector.broadcast %cst_176 : f32 to vector<16x1xf32>
    %224 = arith.divf %222, %223 : vector<16x1xf32>
    %225 = vector.broadcast %224 : vector<16x1xf32> to vector<16x32xf32>
    %226 = arith.subf %220, %225 : vector<16x32xf32>
    %227 = arith.mulf %226, %226 : vector<16x32xf32>
    %cst_177 = arith.constant dense<0.000000e+00> : vector<16xf32>
    %228 = vector.multi_reduction <add>, %227, %cst_177 [1] : vector<16x32xf32> to vector<16xf32>
    %229 = vector.shape_cast %228 : vector<16xf32> to vector<16x1xf32>
    %cst_178 = arith.constant 3.200000e+01 : f32
    %230 = vector.broadcast %cst_178 : f32 to vector<16x1xf32>
    %231 = arith.divf %229, %230 : vector<16x1xf32>
    %232 = vector.broadcast %224 : vector<16x1xf32> to vector<16x32xf32>
    %233 = arith.subf %220, %232 : vector<16x32xf32>
    %cst_179 = arith.constant 9.99999996E-13 : f32
    %234 = vector.broadcast %cst_179 : f32 to vector<16x1xf32>
    %235 = arith.addf %231, %234 : vector<16x1xf32>
    %236 = math.rsqrt %235 : vector<16x1xf32>
    %237 = vector.broadcast %236 : vector<16x1xf32> to vector<16x32xf32>
    %238 = arith.mulf %233, %237 : vector<16x32xf32>
    %c0_180 = arith.constant 0 : index
    %c0_181 = arith.constant 0 : index
    %c0_182 = arith.constant 0 : index
    %239 = vector.load %arg11[%c0_180, %c0_181, %c0_182] : memref<1x1x32xf32, #tpu.memory_space<vmem>>, vector<1x1x32xf32>
    %240 = vector.shape_cast %239 : vector<1x1x32xf32> to vector<1x32xf32>
    %241 = vector.broadcast %240 : vector<1x32xf32> to vector<16x32xf32>
    %242 = arith.mulf %238, %241 : vector<16x32xf32>
    %c0_183 = arith.constant 0 : index
    %c0_184 = arith.constant 0 : index
    %c0_185 = arith.constant 0 : index
    %243 = vector.load %arg12[%c0_183, %c0_184, %c0_185] : memref<1x1x32xf32, #tpu.memory_space<vmem>>, vector<1x1x32xf32>
    %244 = vector.shape_cast %243 : vector<1x1x32xf32> to vector<1x32xf32>
    %245 = vector.broadcast %244 : vector<1x32xf32> to vector<16x32xf32>
    %246 = arith.addf %242, %245 : vector<16x32xf32>
    %c0_186 = arith.constant 0 : index
    %c0_187 = arith.constant 0 : index
    %c0_188 = arith.constant 0 : index
    %247 = vector.load %arg13[%c0_186, %c0_187, %c0_188] : memref<1x32x64xf32, #tpu.memory_space<vmem>>, vector<1x32x64xf32>
    %248 = vector.shape_cast %247 : vector<1x32x64xf32> to vector<32x64xf32>
    %cst_189 = arith.constant dense<0.000000e+00> : vector<16x64xf32>
    %249 = tpu.matmul %246, %248, %cst_189 {dimension_numbers = #tpu.dot_dimension_numbers<[1], [0], [0], [1], [0, 0, 1, 1], [], []>} : vector<16x32xf32>, vector<32x64xf32>, vector<16x64xf32> -> vector<16x64xf32>
    %c0_190 = arith.constant 0 : index
    %c0_191 = arith.constant 0 : index
    %c0_192 = arith.constant 0 : index
    %250 = vector.load %arg14[%c0_190, %c0_191, %c0_192] : memref<1x1x64xf32, #tpu.memory_space<vmem>>, vector<1x1x64xf32>
    %251 = vector.shape_cast %250 : vector<1x1x64xf32> to vector<1x64xf32>
    %252 = vector.broadcast %251 : vector<1x64xf32> to vector<16x64xf32>
    %253 = arith.addf %249, %252 : vector<16x64xf32>
    %cst_193 = arith.constant 5.000000e-01 : f32
    %254 = vector.broadcast %cst_193 : f32 to vector<16x64xf32>
    %255 = arith.mulf %254, %253 : vector<16x64xf32>
    %cst_194 = arith.constant 0.707106769 : f32
    %256 = vector.broadcast %cst_194 : f32 to vector<16x64xf32>
    %257 = arith.mulf %253, %256 : vector<16x64xf32>
    %cst_195 = arith.constant 0.000000e+00 : f32
    %258 = vector.broadcast %cst_195 : f32 to vector<16x64xf32>
    %259 = arith.cmpf oge, %257, %258 : vector<16x64xf32>
    %cst_196 = arith.constant 1.000000e+00 : f32
    %cst_197 = arith.constant -1.000000e+00 : f32
    %260 = vector.broadcast %cst_196 : f32 to vector<16x64xf32>
    %261 = vector.broadcast %cst_197 : f32 to vector<16x64xf32>
    %262 = arith.select %259, %260, %261 : vector<16x64xi1>, vector<16x64xf32>
    %263 = math.absf %257 : vector<16x64xf32>
    %cst_198 = arith.constant 0.327591091 : f32
    %264 = vector.broadcast %cst_198 : f32 to vector<16x64xf32>
    %265 = arith.mulf %264, %263 : vector<16x64xf32>
    %cst_199 = arith.constant 1.000000e+00 : f32
    %266 = vector.broadcast %cst_199 : f32 to vector<16x64xf32>
    %267 = arith.addf %266, %265 : vector<16x64xf32>
    %cst_200 = arith.constant 1.000000e+00 : f32
    %268 = vector.broadcast %cst_200 : f32 to vector<16x64xf32>
    %269 = arith.divf %268, %267 : vector<16x64xf32>
    %cst_201 = arith.constant 1.06140542 : f32
    %270 = vector.broadcast %cst_201 : f32 to vector<16x64xf32>
    %271 = arith.mulf %269, %270 : vector<16x64xf32>
    %cst_202 = arith.constant -1.45315206 : f32
    %272 = vector.broadcast %cst_202 : f32 to vector<16x64xf32>
    %273 = arith.addf %272, %271 : vector<16x64xf32>
    %274 = arith.mulf %269, %273 : vector<16x64xf32>
    %cst_203 = arith.constant 1.42141378 : f32
    %275 = vector.broadcast %cst_203 : f32 to vector<16x64xf32>
    %276 = arith.addf %275, %274 : vector<16x64xf32>
    %277 = arith.mulf %269, %276 : vector<16x64xf32>
    %cst_204 = arith.constant -0.284496725 : f32
    %278 = vector.broadcast %cst_204 : f32 to vector<16x64xf32>
    %279 = arith.addf %278, %277 : vector<16x64xf32>
    %280 = arith.mulf %269, %279 : vector<16x64xf32>
    %cst_205 = arith.constant 0.254829586 : f32
    %281 = vector.broadcast %cst_205 : f32 to vector<16x64xf32>
    %282 = arith.addf %281, %280 : vector<16x64xf32>
    %283 = arith.mulf %269, %282 : vector<16x64xf32>
    %cst_206 = arith.constant 0.000000e+00 : f32
    %284 = vector.broadcast %cst_206 : f32 to vector<16x64xf32>
    %285 = arith.subf %284, %263 : vector<16x64xf32>
    %286 = arith.mulf %285, %263 : vector<16x64xf32>
    %287 = math.exp %286 : vector<16x64xf32>
    %288 = arith.mulf %283, %287 : vector<16x64xf32>
    %cst_207 = arith.constant 1.000000e+00 : f32
    %289 = vector.broadcast %cst_207 : f32 to vector<16x64xf32>
    %290 = arith.subf %289, %288 : vector<16x64xf32>
    %291 = arith.mulf %262, %290 : vector<16x64xf32>
    %cst_208 = arith.constant 1.000000e+00 : f32
    %292 = vector.broadcast %cst_208 : f32 to vector<16x64xf32>
    %293 = arith.addf %292, %291 : vector<16x64xf32>
    %294 = arith.mulf %255, %293 : vector<16x64xf32>
    %c0_209 = arith.constant 0 : index
    %c0_210 = arith.constant 0 : index
    %c0_211 = arith.constant 0 : index
    %295 = vector.load %arg15[%c0_209, %c0_210, %c0_211] : memref<1x64x32xf32, #tpu.memory_space<vmem>>, vector<1x64x32xf32>
    %296 = vector.shape_cast %295 : vector<1x64x32xf32> to vector<64x32xf32>
    %cst_212 = arith.constant dense<0.000000e+00> : vector<16x32xf32>
    %297 = tpu.matmul %294, %296, %cst_212 {dimension_numbers = #tpu.dot_dimension_numbers<[1], [0], [0], [1], [0, 0, 1, 1], [], []>} : vector<16x64xf32>, vector<64x32xf32>, vector<16x32xf32> -> vector<16x32xf32>
    %c0_213 = arith.constant 0 : index
    %c0_214 = arith.constant 0 : index
    %c0_215 = arith.constant 0 : index
    %298 = vector.load %arg16[%c0_213, %c0_214, %c0_215] : memref<1x1x32xf32, #tpu.memory_space<vmem>>, vector<1x1x32xf32>
    %299 = vector.shape_cast %298 : vector<1x1x32xf32> to vector<1x32xf32>
    %300 = vector.broadcast %299 : vector<1x32xf32> to vector<16x32xf32>
    %301 = arith.addf %297, %300 : vector<16x32xf32>
    %302 = arith.addf %301, %246 : vector<16x32xf32>
    %cst_216 = arith.constant dense<0.000000e+00> : vector<16xf32>
    %303 = vector.multi_reduction <add>, %302, %cst_216 [1] : vector<16x32xf32> to vector<16xf32>
    %304 = vector.shape_cast %303 : vector<16xf32> to vector<16x1xf32>
    %cst_217 = arith.constant 3.200000e+01 : f32
    %305 = vector.broadcast %cst_217 : f32 to vector<16x1xf32>
    %306 = arith.divf %304, %305 : vector<16x1xf32>
    %307 = vector.broadcast %306 : vector<16x1xf32> to vector<16x32xf32>
    %308 = arith.subf %302, %307 : vector<16x32xf32>
    %309 = arith.mulf %308, %308 : vector<16x32xf32>
    %cst_218 = arith.constant dense<0.000000e+00> : vector<16xf32>
    %310 = vector.multi_reduction <add>, %309, %cst_218 [1] : vector<16x32xf32> to vector<16xf32>
    %311 = vector.shape_cast %310 : vector<16xf32> to vector<16x1xf32>
    %cst_219 = arith.constant 3.200000e+01 : f32
    %312 = vector.broadcast %cst_219 : f32 to vector<16x1xf32>
    %313 = arith.divf %311, %312 : vector<16x1xf32>
    %314 = vector.broadcast %306 : vector<16x1xf32> to vector<16x32xf32>
    %315 = arith.subf %302, %314 : vector<16x32xf32>
    %cst_220 = arith.constant 9.99999996E-13 : f32
    %316 = vector.broadcast %cst_220 : f32 to vector<16x1xf32>
    %317 = arith.addf %313, %316 : vector<16x1xf32>
    %318 = math.rsqrt %317 : vector<16x1xf32>
    %319 = vector.broadcast %318 : vector<16x1xf32> to vector<16x32xf32>
    %320 = arith.mulf %315, %319 : vector<16x32xf32>
    %c0_221 = arith.constant 0 : index
    %c0_222 = arith.constant 0 : index
    %c0_223 = arith.constant 0 : index
    %321 = vector.load %arg17[%c0_221, %c0_222, %c0_223] : memref<1x1x32xf32, #tpu.memory_space<vmem>>, vector<1x1x32xf32>
    %322 = vector.shape_cast %321 : vector<1x1x32xf32> to vector<1x32xf32>
    %323 = vector.broadcast %322 : vector<1x32xf32> to vector<16x32xf32>
    %324 = arith.mulf %320, %323 : vector<16x32xf32>
    %c0_224 = arith.constant 0 : index
    %c0_225 = arith.constant 0 : index
    %c0_226 = arith.constant 0 : index
    %325 = vector.load %arg18[%c0_224, %c0_225, %c0_226] : memref<1x1x32xf32, #tpu.memory_space<vmem>>, vector<1x1x32xf32>
    %326 = vector.shape_cast %325 : vector<1x1x32xf32> to vector<1x32xf32>
    %327 = vector.broadcast %326 : vector<1x32xf32> to vector<16x32xf32>
    %328 = arith.addf %324, %327 : vector<16x32xf32>
    %c0_227 = arith.constant 0 : index
    %c0_228 = arith.constant 0 : index
    %329 = vector.load %arg19[%c0_227, %c0_228] : memref<16x32xf32, #tpu.memory_space<vmem>>, vector<16x32xf32>
    tpu.vector_store %arg19[%c0_227, %c0_228], %328 {strides = array<i32>} : memref<16x32xf32, #tpu.memory_space<vmem>>, vector<16x32xf32>,
    return
  }
  func.func @transform_0(%arg0: i32) -> (i32, i32) {
    %c0_i32 = arith.constant 0 : i32
    %c0_i32_0 = arith.constant 0 : i32
    %c0_i32_1 = arith.constant 0 : i32
    return %c0_i32, %c0_i32_0 : i32, i32
  }
  func.func @transform_1(%arg0: i32) -> (i32, i32) {
    %c0_i32 = arith.constant 0 : i32
    %c0_i32_0 = arith.constant 0 : i32
    %c0_i32_1 = arith.constant 0 : i32
    return %c0_i32, %c0_i32_0 : i32, i32
  }
  func.func @transform_2(%arg0: i32) -> (i32, i32, i32, i32) {
    %c0_i32 = arith.constant 0 : i32
    %c0_i32_0 = arith.constant 0 : i32
    %c0_i32_1 = arith.constant 0 : i32
    %c0_i32_2 = arith.constant 0 : i32
    return %arg0, %c0_i32, %c0_i32_0, %c0_i32_1 : i32, i32, i32, i32
  }
  func.func @transform_3(%arg0: i32) -> (i32, i32, i32, i32) {
    %c0_i32 = arith.constant 0 : i32
    %c0_i32_0 = arith.constant 0 : i32
    %c0_i32_1 = arith.constant 0 : i32
    %c0_i32_2 = arith.constant 0 : i32
    return %arg0, %c0_i32, %c0_i32_0, %c0_i32_1 : i32, i32, i32, i32
  }
  func.func @transform_4(%arg0: i32) -> (i32, i32, i32, i32) {
    %c0_i32 = arith.constant 0 : i32
    %c0_i32_0 = arith.constant 0 : i32
    %c0_i32_1 = arith.constant 0 : i32
    %c0_i32_2 = arith.constant 0 : i32
    return %arg0, %c0_i32, %c0_i32_0, %c0_i32_1 : i32, i32, i32, i32
  }
  func.func @transform_5(%arg0: i32) -> (i32, i32, i32, i32) {
    %c0_i32 = arith.constant 0 : i32
    %c0_i32_0 = arith.constant 0 : i32
    %c0_i32_1 = arith.constant 0 : i32
    %c0_i32_2 = arith.constant 0 : i32
    return %arg0, %c0_i32, %c0_i32_0, %c0_i32_1 : i32, i32, i32, i32
  }
  func.func @transform_6(%arg0: i32) -> (i32, i32, i32, i32) {
    %c0_i32 = arith.constant 0 : i32
    %c0_i32_0 = arith.constant 0 : i32
    %c0_i32_1 = arith.constant 0 : i32
    %c0_i32_2 = arith.constant 0 : i32
    return %arg0, %c0_i32, %c0_i32_0, %c0_i32_1 : i32, i32, i32, i32
  }
  func.func @transform_7(%arg0: i32) -> (i32, i32, i32, i32) {
    %c0_i32 = arith.constant 0 : i32
    %c0_i32_0 = arith.constant 0 : i32
    %c0_i32_1 = arith.constant 0 : i32
    %c0_i32_2 = arith.constant 0 : i32
    return %arg0, %c0_i32, %c0_i32_0, %c0_i32_1 : i32, i32, i32, i32
  }
  func.func @transform_8(%arg0: i32) -> (i32, i32, i32, i32) {
    %c0_i32 = arith.constant 0 : i32
    %c0_i32_0 = arith.constant 0 : i32
    %c0_i32_1 = arith.constant 0 : i32
    %c0_i32_2 = arith.constant 0 : i32
    return %arg0, %c0_i32, %c0_i32_0, %c0_i32_1 : i32, i32, i32, i32
  }
  func.func @transform_9(%arg0: i32) -> (i32, i32, i32) {
    %c0_i32 = arith.constant 0 : i32
    %c0_i32_0 = arith.constant 0 : i32
    %c0_i32_1 = arith.constant 0 : i32
    return %arg0, %c0_i32, %c0_i32_0 : i32, i32, i32
  }
  func.func @transform_10(%arg0: i32) -> (i32, i32, i32) {
    %c0_i32 = arith.constant 0 : i32
    %c0_i32_0 = arith.constant 0 : i32
    %c0_i32_1 = arith.constant 0 : i32
    return %arg0, %c0_i32, %c0_i32_0 : i32, i32, i32
  }
  func.func @transform_11(%arg0: i32) -> (i32, i32, i32) {
    %c0_i32 = arith.constant 0 : i32
    %c0_i32_0 = arith.constant 0 : i32
    %c0_i32_1 = arith.constant 0 : i32
    return %arg0, %c0_i32, %c0_i32_0 : i32, i32, i32
  }
  func.func @transform_12(%arg0: i32) -> (i32, i32, i32) {
    %c0_i32 = arith.constant 0 : i32
    %c0_i32_0 = arith.constant 0 : i32
    %c0_i32_1 = arith.constant 0 : i32
    return %arg0, %c0_i32, %c0_i32_0 : i32, i32, i32
  }
  func.func @transform_13(%arg0: i32) -> (i32, i32, i32) {
    %c0_i32 = arith.constant 0 : i32
    %c0_i32_0 = arith.constant 0 : i32
    %c0_i32_1 = arith.constant 0 : i32
    return %arg0, %c0_i32, %c0_i32_0 : i32, i32, i32
  }
  func.func @transform_14(%arg0: i32) -> (i32, i32, i32) {
    %c0_i32 = arith.constant 0 : i32
    %c0_i32_0 = arith.constant 0 : i32
    %c0_i32_1 = arith.constant 0 : i32
    return %arg0, %c0_i32, %c0_i32_0 : i32, i32, i32
  }
  func.func @transform_15(%arg0: i32) -> (i32, i32, i32) {
    %c0_i32 = arith.constant 0 : i32
    %c0_i32_0 = arith.constant 0 : i32
    %c0_i32_1 = arith.constant 0 : i32
    return %arg0, %c0_i32, %c0_i32_0 : i32, i32, i32
  }
  func.func @transform_16(%arg0: i32) -> (i32, i32, i32) {
    %c0_i32 = arith.constant 0 : i32
    %c0_i32_0 = arith.constant 0 : i32
    %c0_i32_1 = arith.constant 0 : i32
    return %arg0, %c0_i32, %c0_i32_0 : i32, i32, i32
  }
  func.func @transform_17(%arg0: i32) -> (i32, i32, i32) {
    %c0_i32 = arith.constant 0 : i32
    %c0_i32_0 = arith.constant 0 : i32
    %c0_i32_1 = arith.constant 0 : i32
    return %arg0, %c0_i32, %c0_i32_0 : i32, i32, i32
  }
  func.func @transform_18(%arg0: i32) -> (i32, i32) {
    %c0_i32 = arith.constant 0 : i32
    %c0_i32_0 = arith.constant 0 : i32
    %c0_i32_1 = arith.constant 0 : i32
    return %c0_i32, %c0_i32_0 : i32, i32
  }
  func.func @transform_19(%arg0: i32) -> (i32, i32, i32, i32) {
    %c0_i32 = arith.constant 0 : i32
    %c0_i32_0 = arith.constant 0 : i32
    %c0_i32_1 = arith.constant 0 : i32
    %c0_i32_2 = arith.constant 0 : i32
    return %arg0, %c0_i32, %c0_i32_0, %c0_i32_1 : i32, i32, i32, i32
  }
}

</mosaic_0001>

<bundles_post_ra>
// kernel: tpu_custom_call.1
= control target key start
LH: loop header
LB: loop body
LE: loop exit
PB: predicated region body
PF: predicated region fallthrough
CT: control target
= control target key end

     0   :  { %s5750_s0 = inlined_call_operand.vmem [shape: f32[16,32], index: 0, kind: input, shape index: {}]   ;;  %s5751_s1 = inlined_call_operand.vmem [shape: f32[2,8], index: 1, kind: input, shape index: {}]   ;;  %s5752_s2 = inlined_call_operand.vmem [shape: f32[2,4,32,8], index: 2, kind: input, shape index: {}]   ;;  %s5753_s3 = inlined_call_operand.vmem [shape: f32[2,4,1,8], index: 3, kind: input, shape index: {}]   ;;  %s5754_s4 = inlined_call_operand.vmem [shape: f32[2,4,32,8], index: 4, kind: input, shape index: {}]   ;;  %s5755_s5 = inlined_call_operand.vmem [shape: f32[2,4,1,8], index: 5, kind: input, shape index: {}]   ;;  %s5756_s6 = inlined_call_operand.vmem [shape: f32[2,4,32,8], index: 6, kind: input, shape index: {}]   ;;  %s5757_s7 = inlined_call_operand.vmem [shape: f32[2,4,1,8], index: 7, kind: input, shape index: {}]   ;;  %s5758_s8 = inlined_call_operand.vmem [shape: f32[2,4,8,32], index: 8, kind: input, shape index: {}]   ;;  %s5759_s9 = inlined_call_operand.vmem [shape: f32[2,1,32], index: 9, kind: input, shape index: {}]   ;;  %s5760_s10 = inlined_call_operand.vmem [shape: f32[2,1,32], index: 10, kind: input, shape index: {}]   ;;  %s5761_s11 = inlined_call_operand.vmem [shape: f32[2,1,32], index: 11, kind: input, shape index: {}]   ;;  %s5762_s12 = inlined_call_operand.vmem [shape: f32[2,32,64], index: 12, kind: input, shape index: {}]   ;;  %s5763_s13 = inlined_call_operand.vmem [shape: f32[2,1,64], index: 13, kind: input, shape index: {}]   ;;  %s5764_s14 = inlined_call_operand.vmem [shape: f32[2,64,32], index: 14, kind: input, shape index: {}]   ;;  %s5765_s15 = inlined_call_operand.vmem [shape: f32[2,1,32], index: 15, kind: input, shape index: {}]   ;;  %s5766_s16 = inlined_call_operand.vmem [shape: f32[2,1,32], index: 16, kind: input, shape index: {}]   ;;  %s5767_s17 = inlined_call_operand.vmem [shape: f32[2,1,32], index: 17, kind: input, shape index: {}]   ;;  %s5768_s18 = inlined_call_operand.hbm [shape: f32[16,32], index: 18, kind: output, shape index: {0}]   ;;  %s5769_s19 = inlined_call_operand.hbm [shape: f32[2,8,8,8], index: 19, kind: output, shape index: {1}]  }
   0x1   :  { %5788 = sst [smem:[#allocation20_spill]] %s5750_s0 }
   0x2   :  { %5789 = sst [smem:[#allocation21_spill]] %s5751_s1 }
   0x3   :  { %5790 = sst [smem:[#allocation22_spill]] %s5752_s2 }
   0x4   :  { %5791 = sst [smem:[#allocation23_spill]] %s5753_s3 }
   0x5   :  { %5792 = sst [smem:[#allocation24_spill]] %s5754_s4 }
   0x6   :  { %5793 = sst [smem:[#allocation25_spill]] %s5755_s5 }
   0x7   :  { %5794 = sst [smem:[#allocation26_spill]] %s5756_s6 }
   0x8   :  { %5795 = sst [smem:[#allocation27_spill]] %s5757_s7 }
   0x9   :  { %5796 = sst [smem:[#allocation28_spill]] %s5758_s8 }
   0xa   :  { %5797 = sst [smem:[#allocation29_spill]] %s5762_s12 }
   0xb   :  { %5798 = sst [smem:[#allocation30_spill]] %s5767_s17 }
   0xc   :  { %5799 = sst [smem:[#allocation31_spill]] %s5768_s18 }
   0xd   :  { %5800 = sst [smem:[#allocation32_spill]] %s5769_s19 }
   0xe   :  { %25 = vsyncpa [#allocation3], 0 }
   0xf   :  { %26 = vsyncpa [#allocation5], 0 }
  0x10   :  { %28 = vsyncpa [#allocation5 + $0x1], 0  ;;  %s5199_s0 = smov 0   ;;  %s5201_s30 = smov 0  }
  0x11   :  { %s5203_s20 = smov 0   ;;  %s5205_s21 = smov 0  }
  0x12 LB: > { %5801 = sst [smem:[#allocation8_spill]] %s5076_s0  ;;  %s5220_s1 = sadd.s32 4294967295, %s5088_s21   ;;  %s5088_s21 = sphi %s5205_s21, %s5843_s21   ;;  %s5084_s20 = sphi %s5203_s20, %s5846_s20   ;;  %s5080_s30 = sphi %s5201_s30, %s5845_s30   ;;  %s5076_s0 = sphi %s5199_s0, %s5844_s0  }
  0x13   : > { %5802 = sst [smem:[#allocation9_spill]] %s5080_s30  ;;  %s4207_s22 = sadd.s32 4294967294, %s5088_s21  }
  0x14   : > { %5803 = sst [smem:[#allocation10_spill]] %s5084_s20  ;;  %s5224_s2 = sadd.s32 1, %s5088_s21  }
  0x15   : > { %5804 = sst [smem:[#allocation11_spill]] %s5088_s21  ;;  %s520_s23 = sadd.s32 1, %s5084_s20 }
  0x16   : > { %5805 = sst [smem:[#allocation12_spill]] %s5220_s1  ;;  %s517_s24 = ssub.s32 %s5088_s21, %s5224_s2 }
  0x17   : > { %5806 = sst [smem:[#allocation13_spill]] %s5224_s2  ;;  %p530_p0 = scmp.ne.s32.totalorder %s5084_s20, %s5080_s30 }
  0x18   : > { %p518_p1 = scmp.eq.s32.totalorder %s517_s24, 0  ;;  %p531_p2 = scmp.eq.s32.totalorder %s5220_s1, 1 }
  0x19   : > { %p536_p3 = scmp.ne.s32.totalorder %s5080_s30, %s5076_s0  ;;  %p537_p4 = scmp.eq.s32.totalorder %s4207_s22, 1 }
  0x1a   : > { %s5235_s25 = scalar_select %p518_p1, %s5084_s20, %s520_s23  }
  0x1b   : > { %p5239_p5 = por %p531_p2, %p530_p0  ;;  %p5243_p6 = por %p537_p4, %p536_p3 }
  0x1c   : > { %5807 = sst [smem:[#allocation14_spill]] %s5235_s25  ;;  %p4210_p7 = scmp.ge.s32.totalorder %s5088_s21, 1 }
  0x1d   : > { %s5808_s3 = scalar_select %p5239_p5, 1, 0 }
  0x1e   : > { %s5810_s26 = scalar_select %p5243_p6, 1, 0 }
  0x1f   : > { %5809 = sst [smem:[#allocation15_spill]] %s5808_s3  ;;  %p672_p8 = scmp.lt.s32.totalorder %s5088_s21, 3 }
  0x20   : > { %5811 = sst [smem:[#allocation16_spill]] %s5810_s26 }
  0x21   : > { %p673_p9 = pnand %p4210_p7, %p672_p8 }
  0x23   : > { %676 = sbr.rel (%p673_p9) target bundleno = 5114 (0x13fa), region = 92 }
  0x2a   : > { %s5775_s27 = sand.u32 1, %s5080_s30   ;;  %p786_p10 = scmp.lt.s32.totalorder %s5220_s1, 1 }
  0x2b   : > { %s4211_s28 = sshll.u32 %s5775_s27, 6  ;;  %s5812_s20 = sld [smem:[#allocation22_spill]] }
  0x2c   : > { %s5254_s29 = scalar_select %p786_p10, %s5220_s1, 1 }
  0x2d   : > { %s5814_s0 = sld [smem:[#allocation23_spill]]  ;;  %s5816_s4 = sld [smem:[#allocation24_spill]] }
  0x2e   : > { %s4368_s22 = sshll.u32 %s5254_s29, 7  ;;  %s4214_s23 = sshll.u32 %s5254_s29, 2 }
  0x2f   : > { %s5818_s5 = sld [smem:[#allocation25_spill]]  ;;  %s5819_s6 = sld [smem:[#allocation26_spill]] }
  0x30   : > { %s5820_s7 = sld [smem:[#allocation27_spill]]  ;;  %s5821_s8 = sld [smem:[#allocation28_spill]] }
  0x31   : > { %s5261_s2 = scalar_lea.vmem %s5812_s20, %s4368_s22  ;;  %s5822_s12 = sld [smem:[#allocation29_spill]] }
  0x32   : > { %5813 = sst [smem:[#allocation17_spill]] %s5261_s2  ;;  %s4373_s2 = sshll.u32 %s5254_s29, 6 }
  0x33   : > { %s5266_s21 = scalar_lea.vmem %s5814_s0, %s4214_s23  ;;  %s5271_s3 = scalar_lea.vmem %s5816_s4, %s4368_s22 }
  0x34   : > { %5815 = sst [smem:[#allocation18_spill]] %s5266_s21  ;;  %s4371_s21 = sshll.u32 %s5254_s29, 5 }
  0x35   : > { %5817 = sst [smem:[#allocation19_spill]] %s5271_s3  ;;  %s5276_s17 = scalar_lea.vmem %s5818_s5, %s4214_s23 }
  0x36   : > { %s5281_s24 = scalar_lea.vmem %s5819_s6, %s4368_s22  ;;  %s5286_s0 = scalar_lea.vmem %s5820_s7, %s4214_s23 }
  0x37   : > { %s5296_s30 = scalar_lea.vmem %s5821_s8, %s4371_s21  ;;  %s5309_s6 = scalar_lea.vmem %s5822_s12, %s4371_s21 }
  0x38   : > { %s834_s4 = scalar_lea.vmem %s5763_s13, %s5254_s29  ;;  %s5319_s8 = scalar_lea.vmem %s5764_s14, %s4373_s2 }
  0x39   : > { %s842_s25 = scalar_lea.vmem %s5765_s15, %s5254_s29  ;;  %s845_s23 = scalar_lea.vmem %s5766_s16, %s5254_s29 }
  0x3a   : > { %s5823_s22 = sld [smem:[#allocation30_spill]]  ;;  %s5333_s18 = scalar_lea.vmem [#allocation4], %s4211_s28 }
  0x3b   : > { %s5824_s19 = sld [smem:[#allocation12_spill]] }
  0x40   : > { %s848_s12 = scalar_lea.vmem %s5823_s22, %s5254_s29 }
  0x41   : > { %p4227_p11 = scmp.ne.s32.totalorder %s5824_s19, 0 }
  0x42   : > { %s5825_s3 = sld [smem:[#allocation20_spill]] (!%p4227_p11)  ;;  %vm855_vm0 = vcmask (!%p4227_p11), 261120  }
  0x43   : > { %852 = sbr.rel (%p4227_p11) target bundleno = 74 (0x4a), region = 96 }
  0x48   : > { %v853_v0 = vld [vmem:[%s5825_s3] sm:$0xff] (!%p4227_p11)  ;;  %v854_v1 = vld [vmem:[%s5825_s3 + $0x8] sm:$0xff] (!%p4227_p11) }
  0x49   : > { %856 = vst.msk [vmem:[#allocation2] sm:$0xff] (!%p4227_p11), %vm855_vm0, %v853_v0  ;;  %857 = vst.msk [vmem:[#allocation2 + $0x8] sm:$0xff] (!%p4227_p11), %vm855_vm0, %v854_v1 }
  0x4a PF: > { %s5826_s26 = sld [smem:[#allocation17_spill]]  ;;  %s5827_s28 = sld [smem:[#allocation19_spill]]  ;;  %vm873_vm1 = vcmask 261120   ;;  %v5090_v16 = vmov 0.0   ;;  %vm5091_vm2 = vmmov 0   ;;  %vm1127_vm3 = vcmask 64512  }
  0x4b   : > { %s5828_s22 = sld [smem:[#allocation18_spill]]  ;;  %v4231_v19 = vld [vmem:[%s5276_s17] ss:$0 sm:$0xff]  ;;  %v1042_v28 = vld [vmem:[%s5281_s24 + $0x8] sm:$0xff]  ;;  %v1043_v29 = vld [vmem:[%s5281_s24 + $0x10] sm:$0xff]  ;;  %v1286_v35 = vlaneseq  ;;  %s5829_s27 = sld [smem:[#allocation21_spill]] }
  0x4c   : > { %v1041_v27 = vld [vmem:[%s5281_s24] sm:$0xff]  ;;  %v1044_v31 = vld [vmem:[%s5281_s24 + $0x18] sm:$0xff]  ;;  %v5092_v33 = vmov 1966171168   ;;  %v5093_v40 = vmov 0   ;;  %s5832_s5 = scalar_lea.vmem %s5761_s11, %s5254_s29  ;;  %vm3816_vm11 = vcmask 523264  }
  0x4d   : > { %v4785_v30 = vpack.c.bf16 %v1042_v28, %v1041_v27  ;;  %v4789_v32 = vpack.c.bf16 %v1044_v31, %v1043_v29  ;;  %v1284_v34 = vunpack.c.l.s4 %v5092_v33  ;;  %v1287_v38 = vshrl.u32 %v1286_v35, 7  ;;  %s5095_s7 = smov [#allocation4]  }
  0x4e   : > { %s5000_s2 = sshll.u32 %s5095_s7, 4  ;;  %s5001_s2 = int_to_ptr.vmem [resolvable:$false] %s5000_s2 }
  0x4f   : > { %4786 = vmatprep.subr.bf16.mxu0 %v4785_v30  ;;  %v1285_v37 = vunpack.c.0.s8 %v1284_v34  ;;  %v1311_v47 = vsub.s32 0, %v1287_v38 }
  0x50   : > { %v862_v2 = vld [vmem:[%s5826_s26] sm:$0xff]  ;;  %v863_v3 = vld [vmem:[%s5826_s26 + $0x8] sm:$0xff]  ;;  %v864_v4 = vld [vmem:[%s5826_s26 + $0x10] sm:$0xff]  ;;  %4788 = vmatpush3.bf16.msra.mxu0 %v4785_v30 }
  0x51   : > { %v4769_v5 = vpack.c.bf16 %v863_v3, %v862_v2  ;;  %v865_v6 = vld [vmem:[%s5826_s26 + $0x18] sm:$0xff]  ;;  %v5346_v7 = vld [vmem:[#allocation2] sm:$0xff]  ;;  %v956_v10 = vld [vmem:[%s5827_s28 + $0x8] sm:$0xff]  ;;  %4790 = vmatprep.subr.bf16.mxu0 %v4789_v32  ;;  %v1288_v39 = vsub.s32 %v1285_v37, %v1287_v38 }
  0x52   : > { %v4773_v8 = vpack.c.bf16 %v865_v6, %v864_v4  ;;  %4515 = vmatprep.mubr.msk.f32.mxu1 %vm873_vm1, %v5346_v7  ;;  %v955_v9 = vld [vmem:[%s5827_s28] sm:$0xff]  ;;  %4537 = vmatprep.mubr.msk.f32.mxu0 %vm873_vm1, %v5346_v7  ;;  %v957_v12 = vld [vmem:[%s5827_s28 + $0x10] sm:$0xff]  ;;  %v958_v13 = vld [vmem:[%s5827_s28 + $0x18] sm:$0xff] }
  0x53   : > { %4770 = vmatprep.subr.bf16.mxu1 %v4769_v5  ;;  %v4777_v11 = vpack.c.bf16 %v956_v10, %v955_v9  ;;  %v5356_v14 = vld [vmem:[#allocation2 + $0x8] sm:$0xff]  ;;  %v4781_v15 = vpack.c.bf16 %v958_v13, %v957_v12  ;;  %v4228_v22 = vld [vmem:[%s5828_s22] ss:$0 sm:$0xff]  ;;  %v4245_v28 = vld [vmem:[%s5826_s26 + $0x30] sm:$0xff] }
  0x54   : > { %4772 = vmatpush3.bf16.msra.mxu1 %v4769_v5  ;;  %4792 = vmatpush3.bf16.msra.mxu0 %v4789_v32  ;;  %v860_v36 = vld [vmem:[%s5829_s27] sm:$0x3]  ;;  %v4252_v13 = vld [vmem:[%s5827_s28 + $0x28] sm:$0xff]  ;;  %v4246_v29 = vld [vmem:[%s5826_s26 + $0x38] sm:$0xff] }
  0x55   : > { %4774 = vmatprep.subr.bf16.mxu1 %v4773_v8  ;;  %4550 = vmatprep.subr.mxu0 %v5090_v16  ;;  %vm861_vm4 = vcmp.ne.f32.partialorder %v860_v36, 0.0  ;;  %v4234_v9 = vld [vmem:[%s5286_s0] ss:$0 sm:$0xff]  ;;  %v4797_v32 = vpack.c.bf16 %v4246_v29, %v4245_v28  ;;  %v4256_v37 = vld [vmem:[%s5276_s17 + $0x1] ss:$0 sm:$0xff]  ;;  %v4281_v28 = vld [vmem:[%s5826_s26 + $0x48] sm:$0xff] }
  0x56   : > { %v1282_v41 = vsel %vm861_vm4, 1, %v5093_v40  ;;  %v4251_v12 = vld [vmem:[%s5827_s28 + $0x20] sm:$0xff] }
  0x57   : > { %4538 = vmatmul.mubr.msk.f32.vlgmr.msra.gmra.mrb[0].mxu0 %vm873_vm1, %v5356_v14  ;;  %v1289_v42 = vrot.slane %v1282_v41, %v1288_v39  ;;  %v4248_v41 = vld [vmem:[%s5828_s22 + $0x1] ss:$0 sm:$0xff] }
  0x58   : > { %4776 = vmatpush3.bf16.msra.mxu1 %v4773_v8  ;;  %4552 = vmatprep.mubr.msk.f32.mxu0 %vm5091_vm2, %v5090_v16 }
  0x59   : > { %4778 = vmatprep.subr.bf16.mxu1 %v4777_v11  ;;  %v1290_v43 = vcombine.high %v1289_v42, %v1289_v42  ;;  %v1297_v45 = vrot.slane %v1289_v42, %v1288_v39 }
  0x5b   : > { %4516 = vmatmul.mubr.msk.f32.vlgmr.msra.gmra.mrb[0].mxu1 %vm873_vm1, %v5356_v14  ;;  %v1304_v44 = vrot.slane %v1290_v43, %v1288_v39  ;;  %vm1305_vm6 = vcmp.ne.s32.totalorder %v1297_v45, 0 }
  0x5c   : > { %4780 = vmatpush3.bf16.msra.mxu1 %v4777_v11  ;;  %4526 = vmatprep.mubr.msk.f32.mxu1 %vm873_vm1, %v5346_v7  ;;  %v1307_v48 = vsel %vm1305_vm6, 1, %v5093_v40 }
  0x5d   : > { %4782 = vmatprep.subr.bf16.mxu1 %v4781_v15  ;;  %vm1306_vm5 = vcmp.ne.s32.totalorder %v1304_v44, 0  ;;  %v5393_v52 = vrot.slane %v1307_v48, %v1311_v47  ;;  %v4260_v48 = vld [vmem:[%s5281_s24 + $0x28] sm:$0xff] }
  0x5e   : > { %v1308_v46 = vsel %vm1306_vm5, 1, %v5093_v40 }
  0x5f   : > { %v5391_v50 = vrot.slane %v1308_v46, %v1311_v47  ;;  %vm1317_vm8 = vcmp.eq.s32.totalorder %v5393_v52, 1  ;;  %v4259_v47 = vld [vmem:[%s5281_s24 + $0x20] sm:$0xff] }
  0x60   : > { %4784 = vmatpush3.bf16.msra.mxu1 %v4781_v15 }
  0x61   : > { %4540 = vmatprep.subr.mxu1 %v5090_v16  ;;  %vm1318_vm7 = vcmp.eq.s32.totalorder %v5391_v50, 1 }
  0x63   : > { %4527 = vmatmul.mubr.msk.f32.vlgmr.msra.gmra.mrb[2].mxu1 %vm873_vm1, %v5356_v14 }
  0x64   : > { %4542 = vmatprep.mubr.msk.f32.mxu1 %vm5091_vm2, %v5090_v16 }
 0x12a   : > { %v4539_v8 = vpop.f32.mrb[0].mxu0 }
 0x12b   : > { %v1124_v10 = vadd.f32 %v4539_v8, %v4234_v9  ;;  %v1118_v11 = vpop.f32.mrb[1].mxu0 }
 0x12c   : > { %v1119_v15 = vadd.f32 %v4234_v9, %v1118_v11 }
 0x12e   : > { %v4517_v17 = vpop.f32.mrb[0].mxu1  ;;  %4551 = vmatpush3.msra.mxu0 %v1119_v15 }
 0x12f   : > { %v946_v18 = vpop.f32.mrb[1].mxu1  ;;  %v952_v26 = vadd.f32 %v4517_v17, %v4228_v22  ;;  %v4801_v17 = vpack.c.bf16 %v4252_v13, %v4251_v12  ;;  %v4264_v13 = vld [vmem:[%s5286_s0 + $0x1] ss:$0 sm:$0xff] }
 0x130   : > { %v947_v24 = vadd.f32 %v4228_v22, %v946_v18  ;;  %v4243_v18 = vld [vmem:[%s5826_s26 + $0x20] sm:$0xff] }
 0x136   : > { %v4528_v20 = vpop.f32.mrb[2].mxu1 }
 0x137   : > { %v1032_v21 = vpop.f32.mrb[3].mxu1  ;;  %v1038_v25 = vadd.f32 %v4528_v20, %v4231_v19 }
 0x138   : > { %v1033_v23 = vadd.f32 %v4231_v19, %v1032_v21  ;;  %v4244_v19 = vld [vmem:[%s5826_s26 + $0x28] sm:$0xff] }
 0x139   : > { %v4793_v20 = vpack.c.bf16 %v4244_v19, %v4243_v18 }
 0x13a   : > { %4541 = vmatpush3.xpose.msk.msra.mxu1 %vm1127_vm3, %v1033_v23  ;;  %v4253_v23 = vld [vmem:[%s5827_s28 + $0x30] sm:$0xff] }
 0x13b   : > { %4545 = vmatprep.subr.mxu1 %v5090_v16  ;;  %4794 = vmatprep.subr.bf16.mxu0 %v4793_v20 }
 0x13d   : > { %4543 = vmatmul.mubr.msk.f32.vlgmr.msra.gmra.mrb[4].mxu1 %vm1127_vm3, %v947_v24  ;;  %v4254_v24 = vld [vmem:[%s5827_s28 + $0x38] sm:$0xff] }
 0x13e   : > { %4546 = vmatpush3.xpose.msk.msra.mxu1 %vm1127_vm3, %v1038_v25  ;;  %4547 = vmatprep.mubr.msk.f32.mxu1 %vm5091_vm2, %v5090_v16  ;;  %v4805_v27 = vpack.c.bf16 %v4254_v24, %v4253_v23 }
 0x13f   : > { %4555 = vmatprep.subr.mxu1 %v5090_v16 }
 0x141   : > { %4548 = vmatmul.mubr.msk.f32.vlgmr.msra.gmra.mrb[6].mxu1 %vm1127_vm3, %v952_v26 }
 0x142   : > { %4557 = vmatprep.mubr.msk.f32.mxu1 %vm5091_vm2, %v5090_v16  ;;  %4556 = vmatpush3.msra.mxu1 %v1124_v10 }
 0x143   : > { %4802 = vmatprep.subr.bf16.mxu1 %v4801_v17 }
 0x210   : > { %v1200_v49 = vpop.f32.mrb[4].mxu1 }
 0x211   : > { %v4544_v51 = vpop.f32.mrb[5].mxu1  ;;  %v1280_v54 = vmul.f32 0.35355338, %v1200_v49  ;;  %v4261_v49 = vld [vmem:[%s5281_s24 + $0x30] sm:$0xff] }
 0x212   : > { %v4809_v51 = vpack.c.bf16 %v4260_v48, %v4259_v47  ;;  %v4290_v48 = vld [vmem:[%s5827_s28 + $0x50] sm:$0xff] }
 0x213   : > { %v1319_v59 = vsel %vm1317_vm8, -1e+09, %v1280_v54 }
 0x214   : > { %v1276_v53 = vpop.f32.mrb[6].mxu1  ;;  %v1321_v60 = vsel %vm1127_vm3, %v1319_v59, -inf }
 0x215   : > { %v1281_v55 = vmul.f32 0.35355338, %v1276_v53  ;;  %v4549_v56 = vpop.f32.mrb[7].mxu1  ;;  %v4262_v53 = vld [vmem:[%s5281_s24 + $0x38] sm:$0xff] }
 0x216   : > { %v4813_v54 = vpack.c.bf16 %v4262_v53, %v4261_v49  ;;  %v4291_v49 = vld [vmem:[%s5827_s28 + $0x58] sm:$0xff] }
 0x217   : > { %v1320_v57 = vsel %vm1318_vm7, -1e+09, %v1281_v55 }
 0x218   : > { %v1324_v58 = vsel %vm1127_vm3, %v1320_v57, -inf }
 0x219   : > { %1325 = vmax.xlane.f32.xlu0 %v1324_v58 }
 0x21d   : > { %1322 = vmax.xlane.f32.xlu0 %v1321_v60 }
 0x2a6   : > { %v1326_v61 = vpop.xlane.xlu0 %1325 }
 0x2a7   : > { %v1328_v62 = vsub.f32 %v1320_v57, %v1326_v61 }
 0x2a9   : > { %v1331_v63 = vmul.f32 1.442695, %v1328_v62 }
 0x2aa   : > { %v1323_v0 = vpop.xlane.xlu0 %1322 }
 0x2ab   : > { %4948 = vpow2.f32 %v1331_v63  ;;  %v1327_v1 = vsub.f32 %v1319_v59, %v1323_v0 }
 0x2ad   : > { %v1329_v2 = vmul.f32 1.442695, %v1327_v1 }
 0x2af   : > { %4950 = vpow2.f32 %v1329_v2 }
 0x2b5   : > { %v4949_v3 = vpop.eup %4948 }
 0x2b6   : > { %v1336_v4 = vsel %vm1127_vm3, %v4949_v3, 0.0 }
 0x2b7   : > { %1337 = vadd.xlane.f32.xlu1 %v1336_v4 }
 0x2b9   : > { %v4951_v5 = vpop.eup %4950 }
 0x2ba   : > { %v1333_v6 = vsel %vm1127_vm3, %v4951_v5, 0.0 }
 0x2bb   : > { %1334 = vadd.xlane.f32.xlu1 %v1333_v6 }
 0x344   : > { %v1338_v21 = vpop.xlane.xlu1 %1337 }
 0x345   : > { %4952 = vrcp.f32 %v1338_v21 }
 0x348   : > { %v1335_v22 = vpop.xlane.xlu1 %1334 }
 0x349   : > { %4954 = vrcp.f32 %v1335_v22 }
 0x34f   : > { %v4953_v25 = vpop.eup %4952 }
 0x350   : > { %v1342_v26 = vmul.f32 %v4953_v25, %v4949_v3  ;;  %v4275_v25 = vld [vmem:[%s5296_s30 + $0x8] sm:$0xff] }
 0x352   : > { %1344 = vst.msk [vmem:[%s5333_s18 + $0x8] sm:$0xff] %vm1127_vm3, %v1342_v26  ;;  %4558 = vmatmul.mubr.msk.f32.vlgmr.msra.gmra.mrb[8].mxu1 %vm1127_vm3, %v1342_v26  ;;  %v1491_v26 = vld [vmem:[%s5296_s30] sm:$0xff] }
 0x353   : > { %v4955_v30 = vpop.eup %4954  ;;  %4804 = vmatpush3.bf16.msra.mxu1 %v4801_v17  ;;  %4579 = vmatprep.mubr.msk.f32.mxu1 %vm873_vm1, %v5346_v7 }
 0x354   : > { %v1340_v31 = vmul.f32 %v4955_v30, %v4951_v5  ;;  %4806 = vmatprep.subr.bf16.mxu1 %v4805_v27  ;;  %v4282_v30 = vld [vmem:[%s5826_s26 + $0x50] sm:$0xff] }
 0x356   : > { %1343 = vst.msk [vmem:[%s5333_s18] sm:$0xff] %vm1127_vm3, %v1340_v31  ;;  %4553 = vmatmul.mubr.msk.f32.vlgmr.msra.gmra.mrb[2].mxu0 %vm1127_vm3, %v1340_v31  ;;  %v4283_v31 = vld [vmem:[%s5826_s26 + $0x58] sm:$0xff] }
 0x357   : > { %4796 = vmatpush3.bf16.msra.mxu0 %v4793_v20  ;;  %4808 = vmatpush3.bf16.msra.mxu1 %v4805_v27  ;;  %v4280_v27 = vld [vmem:[%s5826_s26 + $0x40] sm:$0xff] }
 0x358   : > { %4798 = vmatprep.subr.bf16.mxu0 %v4797_v32  ;;  %4568 = vmatprep.mubr.msk.f32.mxu0 %vm873_vm1, %v5346_v7  ;;  %v4817_v29 = vpack.c.bf16 %v4281_v28, %v4280_v27 }
 0x359   : > { %4593 = vmatprep.subr.mxu1 %v5090_v16 }
 0x35a   : > { %4580 = vmatmul.mubr.msk.f32.vlgmr.msra.gmra.mrb[10].mxu1 %vm873_vm1, %v5356_v14 }
 0x35b   : > { %4800 = vmatpush3.bf16.msra.mxu0 %v4797_v32  ;;  %4595 = vmatprep.mubr.msk.f32.mxu1 %vm5091_vm2, %v5090_v16  ;;  %v4821_v32 = vpack.c.bf16 %v4283_v31, %v4282_v30 }
 0x35c   : > { %4810 = vmatprep.subr.bf16.mxu0 %v4809_v51 }
 0x35e   : > { %4569 = vmatmul.mubr.msk.f32.vlgmr.msra.gmra.mrb[4].mxu0 %vm873_vm1, %v5356_v14 }
 0x35f   : > { %4590 = vmatprep.mubr.msk.f32.mxu0 %vm873_vm1, %v5346_v7  ;;  %4812 = vmatpush3.bf16.msra.mxu0 %v4809_v51  ;;  %v4829_v51 = vpack.c.bf16 %v4291_v49, %v4290_v48 }
 0x360   : > { %4814 = vmatprep.subr.bf16.mxu0 %v4813_v54 }
 0x363   : > { %4816 = vmatpush3.bf16.msra.mxu0 %v4813_v54 }
 0x364   : > { %4603 = vmatprep.subr.mxu0 %v5090_v16 }
 0x366   : > { %4591 = vmatmul.mubr.msk.f32.vlgmr.msra.gmra.mrb[6].mxu0 %vm873_vm1, %v5356_v14 }
 0x367   : > { %4605 = vmatprep.mubr.msk.f32.mxu0 %vm5091_vm2, %v5090_v16 }
 0x425   : > { %v5433_v33 = vpop.f32.mrb[8].mxu1 }
 0x426   : > { %v4559_v34 = vpop.f32.mrb[9].mxu1 }
 0x427   : > { %v4296_v34 = vld [vmem:[%s5281_s24 + $0x40] sm:$0xff] }
 0x429   : > { %v5435_v35 = vpop.f32.mrb[2].mxu0 }
 0x42a   : > { %v4554_v36 = vpop.f32.mrb[3].mxu0 }
 0x42b   : > { %v4297_v36 = vld [vmem:[%s5281_s24 + $0x48] sm:$0xff] }
 0x42d   : > { %v4581_v38 = vpop.f32.mrb[10].mxu1 }
 0x42e   : > { %v1659_v39 = vpop.f32.mrb[11].mxu1  ;;  %v1665_v45 = vadd.f32 %v4581_v38, %v4256_v37  ;;  %v4833_v38 = vpack.c.bf16 %v4297_v36, %v4296_v34  ;;  %v4324_v34 = vld [vmem:[%s5827_s28 + $0x68] sm:$0xff] }
 0x42f   : > { %v1660_v40 = vadd.f32 %v4256_v37, %v1659_v39  ;;  %v4298_v37 = vld [vmem:[%s5281_s24 + $0x50] sm:$0xff]  ;;  %v4299_v39 = vld [vmem:[%s5281_s24 + $0x58] sm:$0xff] }
 0x431   : > { %v4570_v42 = vpop.f32.mrb[4].mxu0  ;;  %4594 = vmatpush3.xpose.msk.msra.mxu1 %vm1127_vm3, %v1660_v40  ;;  %v4837_v40 = vpack.c.bf16 %v4299_v39, %v4298_v37  ;;  %v4315_v37 = vld [vmem:[%s5826_s26 + $0x60] sm:$0xff] }
 0x432   : > { %v1571_v43 = vpop.f32.mrb[5].mxu0  ;;  %4598 = vmatprep.subr.mxu1 %v5090_v16  ;;  %v1577_v46 = vadd.f32 %v4570_v42, %v4248_v41  ;;  %v4288_v42 = vld [vmem:[%s5827_s28 + $0x40] sm:$0xff] }
 0x433   : > { %v1572_v44 = vadd.f32 %v4248_v41, %v1571_v43  ;;  %v4289_v43 = vld [vmem:[%s5827_s28 + $0x48] sm:$0xff] }
 0x435   : > { %4596 = vmatmul.mubr.msk.f32.vlgmr.msra.gmra.mrb[12].mxu1 %vm1127_vm3, %v1572_v44 }
 0x436   : > { %4599 = vmatpush3.xpose.msk.msra.mxu1 %vm1127_vm3, %v1665_v45  ;;  %4600 = vmatprep.mubr.msk.f32.mxu1 %vm5091_vm2, %v5090_v16  ;;  %v4825_v45 = vpack.c.bf16 %v4289_v43, %v4288_v42  ;;  %v4325_v43 = vld [vmem:[%s5827_s28 + $0x70] sm:$0xff] }
 0x437   : > { %4608 = vmatprep.subr.mxu1 %v5090_v16 }
 0x439   : > { %4601 = vmatmul.mubr.msk.f32.vlgmr.msra.gmra.mrb[14].mxu1 %vm1127_vm3, %v1577_v46  ;;  %v4592_v12 = vpop.f32.mrb[6].mxu0 }
 0x43a   : > { %4610 = vmatprep.mubr.msk.f32.mxu1 %vm5091_vm2, %v5090_v16  ;;  %v1747_v15 = vpop.f32.mrb[7].mxu0  ;;  %v1753_v18 = vadd.f32 %v4592_v12, %v4264_v13 }
 0x43b   : > { %v1748_v17 = vadd.f32 %v4264_v13, %v1747_v15 }
 0x43c   : > { %4609 = vmatpush3.msra.mxu1 %v1753_v18 }
 0x43d   : > { %4604 = vmatpush3.msra.mxu0 %v1748_v17  ;;  %4818 = vmatprep.subr.bf16.mxu1 %v4817_v29 }
 0x43e   : > { %4613 = vmatprep.subr.mxu0 %v4275_v25 }
 0x508   : > { %v1828_v55 = vpop.f32.mrb[12].mxu1 }
 0x509   : > { %v1908_v56 = vmul.f32 0.35355338, %v1828_v55  ;;  %v4597_v57 = vpop.f32.mrb[13].mxu1 }
 0x50b   : > { %v1910_v58 = vsel %vm1317_vm8, -1e+09, %v1908_v56  ;;  %v4293_v56 = vld [vmem:[%s5276_s17 + $0x2] ss:$0 sm:$0xff] }
 0x50c   : > { %v1904_v59 = vpop.f32.mrb[14].mxu1  ;;  %v1912_v60 = vsel %vm1127_vm3, %v1910_v58, -inf }
 0x50d   : > { %v1909_v61 = vmul.f32 0.35355338, %v1904_v59  ;;  %1913 = vmax.xlane.f32.xlu0 %v1912_v60  ;;  %v4602_v62 = vpop.f32.mrb[15].mxu1 }
 0x50f   : > { %v1911_v63 = vsel %vm1318_vm7, -1e+09, %v1909_v61 }
 0x510   : > { %v1915_v0 = vsel %vm1127_vm3, %v1911_v63, -inf }
 0x511   : > { %1916 = vmax.xlane.f32.xlu1 %v1915_v0 }
 0x59a   : > { %v1914_v1 = vpop.xlane.xlu0 %1913 }
 0x59b   : > { %v1918_v2 = vsub.f32 %v1910_v58, %v1914_v1  ;;  %v4301_v58 = vld [vmem:[%s5286_s0 + $0x2] ss:$0 sm:$0xff] }
 0x59d   : > { %v1920_v3 = vmul.f32 1.442695, %v1918_v2 }
 0x59e   : > { %v1917_v4 = vpop.xlane.xlu1 %1916 }
 0x59f   : > { %4956 = vpow2.f32 %v1920_v3  ;;  %v1919_v5 = vsub.f32 %v1911_v63, %v1917_v4 }
 0x5a1   : > { %v1922_v6 = vmul.f32 1.442695, %v1919_v5 }
 0x5a3   : > { %4958 = vpow2.f32 %v1922_v6 }
 0x5a9   : > { %v4957_v8 = vpop.eup %4956 }
 0x5aa   : > { %v1924_v9 = vsel %vm1127_vm3, %v4957_v8, 0.0 }
 0x5ab   : > { %1925 = vadd.xlane.f32.xlu0 %v1924_v9 }
 0x5ad   : > { %v4959_v10 = vpop.eup %4958 }
 0x5ae   : > { %v1927_v11 = vsel %vm1127_vm3, %v4959_v10, 0.0 }
 0x5af   : > { %1928 = vadd.xlane.f32.xlu1 %v1927_v11 }
 0x638   : > { %v1926_v19 = vpop.xlane.xlu0 %1925 }
 0x639   : > { %4960 = vrcp.f32 %v1926_v19 }
 0x63c   : > { %v1929_v20 = vpop.xlane.xlu1 %1928 }
 0x63d   : > { %4962 = vrcp.f32 %v1929_v20 }
 0x643   : > { %v4961_v21 = vpop.eup %4960 }
 0x644   : > { %v1931_v22 = vmul.f32 %v4961_v21, %v4957_v8 }
 0x646   : > { %4271 = vst.msk [vmem:[%s5333_s18 + $0x10] sm:$0xff] %vm1127_vm3, %v1931_v22  ;;  %4606 = vmatmul.mubr.msk.f32.vlgmr.msra.gmra.mrb[8].mxu0 %vm1127_vm3, %v1931_v22 }
 0x647   : > { %v4963_v23 = vpop.eup %4962  ;;  %4614 = vmatpush3.msra.mxu0 %v4275_v25  ;;  %v4312_v25 = vld [vmem:[%s5296_s30 + $0x10] sm:$0xff] }
 0x648   : > { %v1933_v24 = vmul.f32 %v4963_v23, %v4959_v10  ;;  %4618 = vmatprep.subr.mxu0 %v1491_v26 }
 0x64a   : > { %4272 = vst.msk [vmem:[%s5333_s18 + $0x18] sm:$0xff] %vm1127_vm3, %v1933_v24  ;;  %4611 = vmatmul.mubr.msk.f32.vlgmr.msra.gmra.mrb[16].mxu1 %vm1127_vm3, %v1933_v24 }
 0x64b   : > { %4631 = vmatprep.mubr.msk.f32.mxu1 %vm873_vm1, %v5346_v7  ;;  %4820 = vmatpush3.bf16.msra.mxu1 %v4817_v29 }
 0x64c   : > { %4822 = vmatprep.subr.bf16.mxu1 %v4821_v32 }
 0x64f   : > { %4824 = vmatpush3.bf16.msra.mxu1 %v4821_v32  ;;  %v4323_v32 = vld [vmem:[%s5827_s28 + $0x60] sm:$0xff] }
 0x650   : > { %4834 = vmatprep.subr.bf16.mxu1 %v4833_v38  ;;  %v4849_v36 = vpack.c.bf16 %v4324_v34, %v4323_v32  ;;  %v4347_v34 = vld [vmem:[%s5296_s30 + $0x18] sm:$0xff] }
 0x652   : > { %4632 = vmatmul.mubr.msk.f32.vlgmr.msra.gmra.mrb[18].mxu1 %vm873_vm1, %v5356_v14 }
 0x653   : > { %4653 = vmatprep.mubr.msk.f32.mxu1 %vm873_vm1, %v5346_v7  ;;  %4836 = vmatpush3.bf16.msra.mxu1 %v4833_v38  ;;  %v4316_v38 = vld [vmem:[%s5826_s26 + $0x68] sm:$0xff] }
 0x654   : > { %4838 = vmatprep.subr.bf16.mxu1 %v4837_v40  ;;  %v4841_v39 = vpack.c.bf16 %v4316_v38, %v4315_v37 }
 0x657   : > { %4840 = vmatpush3.bf16.msra.mxu1 %v4837_v40  ;;  %v4317_v40 = vld [vmem:[%s5826_s26 + $0x70] sm:$0xff] }
 0x658   : > { %4661 = vmatprep.subr.mxu1 %v5090_v16 }
 0x65a   : > { %4654 = vmatmul.mubr.msk.f32.vlgmr.msra.gmra.mrb[20].mxu1 %vm873_vm1, %v5356_v14 }
 0x65b   : > { %4663 = vmatprep.mubr.msk.f32.mxu1 %vm5091_vm2, %v5090_v16 }
 0x719   : > { %v2006_v41 = vpop.f32.mrb[8].mxu0 }
 0x71a   : > { %v4607_v44 = vpop.f32.mrb[9].mxu0  ;;  %4615 = vmatprep.mubr.msk.f32.mxu0 %vm1127_vm3, %v2006_v41  ;;  %v4318_v41 = vld [vmem:[%s5826_s26 + $0x78] sm:$0xff] }
 0x71b   : > { %v4845_v42 = vpack.c.bf16 %v4318_v41, %v4317_v40  ;;  %v4326_v44 = vld [vmem:[%s5827_s28 + $0x78] sm:$0xff]  ;;  %s5833_s28 = sld [smem:[#allocation12_spill]] }
 0x71c   : > { %v4853_v48 = vpack.c.bf16 %v4326_v44, %v4325_v43 }
 0x71d   : > { %v2079_v46 = vpop.f32.mrb[16].mxu1 }
 0x71e   : > { %v4612_v47 = vpop.f32.mrb[17].mxu1  ;;  %4616 = vmatmul.mubr.msk.f32.vlgmr.msra.gmra.mrb[10].mxu0 %vm1127_vm3, %v2079_v46 }
 0x71f   : > { %4619 = vmatpush3.msra.mxu0 %v1491_v26  ;;  %4620 = vmatprep.mubr.msk.f32.mxu0 %vm1127_vm3, %v5435_v35 }
 0x720   : > { %4826 = vmatprep.subr.bf16.mxu0 %v4825_v45 }
 0x721   : > { %s4374_s20 = sshll.u32 %s5833_s28, 10 }
 0x725   : > { %v4633_v35 = vpop.f32.mrb[18].mxu1 }
 0x726   : > { %4621 = vmatmul.mubr.msk.f32.vlgmr.msra.gmra.mrb[10].mxu0 %vm1127_vm3, %v5433_v33  ;;  %v2326_v53 = vpop.f32.mrb[19].mxu1  ;;  %v4285_v33 = vld [vmem:[%s5828_s22 + $0x2] ss:$0 sm:$0xff] }
 0x727   : > { %4828 = vmatpush3.bf16.msra.mxu0 %v4825_v45  ;;  %4642 = vmatprep.mubr.msk.f32.mxu0 %vm873_vm1, %v5346_v7  ;;  %v2332_v62 = vadd.f32 %v4633_v35, %v4285_v33  ;;  %v2327_v63 = vadd.f32 %v4285_v33, %v2326_v53  ;;  %v4328_v53 = vld [vmem:[%s5276_s17 + $0x3] ss:$0 sm:$0xff]  ;;  %s5836_s17 = sld [smem:[#allocation32_spill]] }
 0x728   : > { %4830 = vmatprep.subr.bf16.mxu0 %v4829_v51 }
 0x72b   : > { %4832 = vmatpush3.bf16.msra.mxu0 %v4829_v51 }
 0x72c   : > { %4656 = vmatprep.subr.mxu0 %v5090_v16 }
 0x72d   : > { %v4655_v54 = vpop.f32.mrb[20].mxu1 }
 0x72e   : > { %4643 = vmatmul.mubr.msk.f32.vlgmr.msra.gmra.mrb[12].mxu0 %vm873_vm1, %v5356_v14  ;;  %v2502_v55 = vpop.f32.mrb[21].mxu1  ;;  %v2508_v0 = vadd.f32 %v4655_v54, %v4301_v58 }
 0x72f   : > { %4658 = vmatprep.mubr.msk.f32.mxu0 %vm5091_vm2, %v5090_v16  ;;  %v2503_v1 = vadd.f32 %v4301_v58, %v2502_v55  ;;  %v4320_v55 = vld [vmem:[%s5828_s22 + $0x3] ss:$0 sm:$0xff]  ;;  %s5834_s22 = sld [smem:[#allocation9_spill]] }
 0x735   : > { %s5837_s30 = sand.u32 1, %s5834_s22  }
 0x736   : > { %s5669_s19 = scalar_lea.sflag [#allocation5], %s5837_s30 }
 0x801   : > { %v4644_v57 = vpop.f32.mrb[12].mxu0 }
 0x802   : > { %v2420_v59 = vadd.f32 %v4644_v57, %v4293_v56  ;;  %v2414_v60 = vpop.f32.mrb[13].mxu0 }
 0x803   : > { %v2415_v61 = vadd.f32 %v4293_v56, %v2414_v60  ;;  %v4331_v60 = vld [vmem:[%s5281_s24 + $0x60] sm:$0xff] }
 0x804   : > { %4662 = vmatpush3.xpose.msk.msra.mxu1 %vm1127_vm3, %v2420_v59 }
 0x805   : > { %4657 = vmatpush3.xpose.msk.msra.mxu0 %vm1127_vm3, %v2415_v61  ;;  %4671 = vmatprep.subr.mxu1 %v5090_v16  ;;  %v4332_v61 = vld [vmem:[%s5281_s24 + $0x68] sm:$0xff] }
 0x806   : > { %4666 = vmatprep.subr.mxu0 %v5090_v16 }
 0x807   : > { %4664 = vmatmul.mubr.msk.f32.vlgmr.msra.gmra.mrb[22].mxu1 %vm1127_vm3, %v2332_v62  ;;  %v4333_v62 = vld [vmem:[%s5281_s24 + $0x70] sm:$0xff] }
 0x808   : > { %4659 = vmatmul.mubr.msk.f32.vlgmr.msra.gmra.mrb[14].mxu0 %vm1127_vm3, %v2327_v63  ;;  %4672 = vmatpush3.msra.mxu1 %v2508_v0  ;;  %v4857_v63 = vpack.c.bf16 %v4332_v61, %v4331_v60  ;;  %v4334_v0 = vld [vmem:[%s5281_s24 + $0x78] sm:$0xff]  ;;  %v3657_v60 = vld [vmem:[%s5309_s6 + $0x10] sm:$0xff]  ;;  %s5662_s24 = scalar_lea.hbm %s5836_s17, %s4374_s20 }
 0x809   : > { %4667 = vmatpush3.msra.mxu0 %v2503_v1  ;;  %4673 = vmatprep.mubr.msk.f32.mxu1 %vm5091_vm2, %v5090_v16  ;;  %v4861_v1 = vpack.c.bf16 %v4334_v0, %v4333_v62  ;;  %v3658_v61 = vld [vmem:[%s5309_s6 + $0x18] sm:$0xff] }
 0x80a   : > { %4668 = vmatprep.mubr.msk.f32.mxu0 %vm5091_vm2, %v5090_v16  ;;  %4676 = vmatprep.subr.mxu0 %v4312_v25  ;;  %v4869_v62 = vpack.c.bf16 %v3658_v61, %v3657_v60 }
 0x80b   : > { %4842 = vmatprep.subr.bf16.mxu1 %v4841_v39 }
 0x8da   : > { %v2659_v2 = vpop.f32.mrb[22].mxu1 }
 0x8db   : > { %v2664_v3 = vmul.f32 0.35355338, %v2659_v2  ;;  %v2583_v4 = vpop.f32.mrb[14].mxu0  ;;  %v4665_v5 = vpop.f32.mrb[23].mxu1 }
 0x8dc   : > { %v2663_v6 = vmul.f32 0.35355338, %v2583_v4  ;;  %v4660_v8 = vpop.f32.mrb[15].mxu0 }
 0x8dd   : > { %v2666_v9 = vsel %vm1318_vm7, -1e+09, %v2664_v3 }
 0x8de   : > { %v2670_v10 = vsel %vm1127_vm3, %v2666_v9, -inf  ;;  %v2665_v11 = vsel %vm1317_vm8, -1e+09, %v2663_v6 }
 0x8df   : > { %2671 = vmax.xlane.f32.xlu1 %v2670_v10  ;;  %v2667_v12 = vsel %vm1127_vm3, %v2665_v11, -inf }
 0x8e0   : > { %2668 = vmax.xlane.f32.xlu0 %v2667_v12 }
 0x96c   : > { %v2672_v13 = vpop.xlane.xlu1 %2671 }
 0x96d   : > { %v2674_v15 = vsub.f32 %v2666_v9, %v2672_v13  ;;  %v2669_v17 = vpop.xlane.xlu0 %2668 }
 0x96e   : > { %v2673_v18 = vsub.f32 %v2665_v11, %v2669_v17 }
 0x96f   : > { %v2677_v19 = vmul.f32 1.442695, %v2674_v15 }
 0x970   : > { %v2675_v20 = vmul.f32 1.442695, %v2673_v18 }
 0x971   : > { %4964 = vpow2.f32 %v2677_v19 }
 0x972   : > { %4966 = vpow2.f32 %v2675_v20 }
 0x97b   : > { %v4965_v21 = vpop.eup %4964 }
 0x97c   : > { %v4967_v22 = vpop.eup %4966  ;;  %v2682_v23 = vsel %vm1127_vm3, %v4965_v21, 0.0 }
 0x97d   : > { %2683 = vadd.xlane.f32.xlu1 %v2682_v23  ;;  %v2679_v24 = vsel %vm1127_vm3, %v4967_v22, 0.0  ;;  %v4336_v23 = vld [vmem:[%s5286_s0 + $0x3] ss:$0 sm:$0xff]  ;;  %s5830_s0 = scalar_lea.vmem %s5759_s9, %s5254_s29 }
 0x97e   : > { %2680 = vadd.xlane.f32.xlu0 %v2679_v24  ;;  %v4350_v40 = vld [vmem:[%s5830_s0] ss:$0 sm:$0xff]  ;;  %s3973_s0 = sshll.u32 %s5333_s18, 4  ;;  %s5665_s0 = int_to_ptr.vmem [resolvable:$true] %s3973_s0 }
 0x97f   : > { %p5003_p1 = scmp.lt.s32.totalorder %s5665_s0, %s5001_s2 }
 0xa0a   : > { %v2684_v26 = vpop.xlane.xlu1 %2683 }
 0xa0b   : > { %4968 = vrcp.f32 %v2684_v26  ;;  %v2681_v27 = vpop.xlane.xlu0 %2680 }
 0xa0c   : > { %4970 = vrcp.f32 %v2681_v27 }
 0xa15   : > { %v4969_v28 = vpop.eup %4968 }
 0xa16   : > { %v4971_v29 = vpop.eup %4970  ;;  %v2688_v30 = vmul.f32 %v4969_v28, %v4965_v21 }
 0xa17   : > { %v2686_v31 = vmul.f32 %v4971_v29, %v4967_v22 }
 0xa18   : > { %4309 = vst.msk [vmem:[%s5333_s18 + $0x28] sm:$0xff] %vm1127_vm3, %v2688_v30  ;;  %4674 = vmatmul.mubr.msk.f32.vlgmr.msra.gmra.mrb[24].mxu1 %vm1127_vm3, %v2688_v30 }
 0xa19   : > { %4308 = vst.msk [vmem:[%s5333_s18 + $0x20] sm:$0xff] %vm1127_vm3, %v2686_v31  ;;  %4669 = vmatmul.mubr.msk.f32.vlgmr.msra.gmra.mrb[16].mxu0 %vm1127_vm3, %v2686_v31  ;;  %4689 = vmatprep.mubr.msk.f32.mxu1 %vm873_vm1, %v5346_v7 }
 0xa1a   : > { %4677 = vmatpush3.msra.mxu0 %v4312_v25  ;;  %4844 = vmatpush3.bf16.msra.mxu1 %v4841_v39 }
 0xa1b   : > { %4850 = vmatprep.subr.bf16.mxu0 %v4849_v36  ;;  %4846 = vmatprep.subr.bf16.mxu1 %v4845_v42 }
 0xa1e   : > { %4848 = vmatpush3.bf16.msra.mxu1 %v4845_v42 }
 0xa1f   : > { %4858 = vmatprep.subr.bf16.mxu1 %v4857_v63 }
 0xa21   : > { %4690 = vmatmul.mubr.msk.f32.vlgmr.msra.gmra.mrb[26].mxu1 %vm873_vm1, %v5356_v14 }
 0xa22   : > { %4711 = vmatprep.mubr.msk.f32.mxu1 %vm873_vm1, %v5346_v7  ;;  %4860 = vmatpush3.bf16.msra.mxu1 %v4857_v63 }
 0xa23   : > { %4862 = vmatprep.subr.bf16.mxu1 %v4861_v1 }
 0xa26   : > { %4864 = vmatpush3.bf16.msra.mxu1 %v4861_v1 }
 0xa27   : > { %4724 = vmatprep.subr.mxu1 %v5090_v16 }
 0xa29   : > { %4712 = vmatmul.mubr.msk.f32.vlgmr.msra.gmra.mrb[28].mxu1 %vm873_vm1, %v5356_v14 }
 0xa2a   : > { %4726 = vmatprep.mubr.msk.f32.mxu1 %vm5091_vm2, %v5090_v16 }
 0xaeb   : > { %v2834_v45 = vpop.f32.mrb[24].mxu1 }
 0xaec   : > { %v2761_v46 = vpop.f32.mrb[16].mxu0  ;;  %v4675_v47 = vpop.f32.mrb[25].mxu1 }
 0xaed   : > { %v4670_v49 = vpop.f32.mrb[17].mxu0  ;;  %4678 = vmatprep.mubr.msk.f32.mxu0 %vm1127_vm3, %v2761_v46 }
 0xaee   : > { %4679 = vmatmul.mubr.msk.f32.vlgmr.msra.gmra.mrb[10].mxu0 %vm1127_vm3, %v2834_v45 }
 0xaef   : > { %4852 = vmatpush3.bf16.msra.mxu0 %v4849_v36  ;;  %4700 = vmatprep.mubr.msk.f32.mxu0 %vm873_vm1, %v5346_v7 }
 0xaf0   : > { %4854 = vmatprep.subr.bf16.mxu0 %v4853_v48 }
 0xaf3   : > { %4856 = vmatpush3.bf16.msra.mxu0 %v4853_v48 }
 0xaf4   : > { %4714 = vmatprep.subr.mxu0 %v5090_v16  ;;  %v4691_v51 = vpop.f32.mrb[26].mxu1 }
 0xaf5   : > { %v3002_v35 = vpop.f32.mrb[27].mxu1  ;;  %v3008_v59 = vadd.f32 %v4691_v51, %v4320_v55 }
 0xaf6   : > { %4701 = vmatmul.mubr.msk.f32.vlgmr.msra.gmra.mrb[18].mxu0 %vm873_vm1, %v5356_v14  ;;  %v3003_v57 = vadd.f32 %v4320_v55, %v3002_v35 }
 0xaf7   : > { %4716 = vmatprep.mubr.msk.f32.mxu0 %vm5091_vm2, %v5090_v16 }
 0xafc   : > { %v4713_v22 = vpop.f32.mrb[28].mxu1 }
 0xafd   : > { %v3178_v24 = vpop.f32.mrb[29].mxu1  ;;  %v3184_v26 = vadd.f32 %v4713_v22, %v4336_v23  ;;  %v3806_v22 = vld [vmem:[%s5319_s8 + $0x28] sm:$0xff] }
 0xafe   : > { %v3179_v25 = vadd.f32 %v4336_v23, %v3178_v24  ;;  %v3807_v24 = vld [vmem:[%s5319_s8 + $0x30] sm:$0xff] }
 0xb00   : > { %4725 = vmatpush3.msra.mxu1 %v3179_v25  ;;  %v3808_v25 = vld [vmem:[%s5319_s8 + $0x38] sm:$0xff] }
 0xbc9   : > { %v4702_v54 = vpop.f32.mrb[18].mxu0 }
 0xbca   : > { %v3090_v56 = vpop.f32.mrb[19].mxu0  ;;  %v3096_v58 = vadd.f32 %v4702_v54, %v4328_v53 }
 0xbcb   : > { %v3091_v33 = vadd.f32 %v4328_v53, %v3090_v56 }
 0xbcd   : > { %4715 = vmatpush3.xpose.msk.msra.mxu0 %vm1127_vm3, %v3091_v33 }
 0xbce   : > { %4719 = vmatprep.subr.mxu0 %v5090_v16 }
 0xbd0   : > { %4717 = vmatmul.mubr.msk.f32.vlgmr.msra.gmra.mrb[20].mxu0 %vm1127_vm3, %v3003_v57  ;;  %v3655_v57 = vld [vmem:[%s5309_s6] sm:$0xff] }
 0xbd1   : > { %4720 = vmatpush3.xpose.msk.msra.mxu0 %vm1127_vm3, %v3096_v58  ;;  %4721 = vmatprep.mubr.msk.f32.mxu0 %vm5091_vm2, %v5090_v16  ;;  %v3656_v58 = vld [vmem:[%s5309_s6 + $0x8] sm:$0xff]  ;;  %s5831_s6 = scalar_lea.vmem %s5760_s10, %s5254_s29 }
 0xbd2   : > { %4729 = vmatprep.subr.mxu0 %v5090_v16 }
 0xbd4   : > { %4722 = vmatmul.mubr.msk.f32.vlgmr.msra.gmra.mrb[22].mxu0 %vm1127_vm3, %v3008_v59  ;;  %v4865_v59 = vpack.c.bf16 %v3656_v58, %v3655_v57 }
 0xbd5   : > { %4731 = vmatprep.mubr.msk.f32.mxu0 %vm5091_vm2, %v5090_v16  ;;  %4730 = vmatpush3.msra.mxu0 %v3184_v26  ;;  %v4885_v26 = vpack.c.bf16 %v3808_v25, %v3807_v24 }
 0xbd6   : > { %4734 = vmatprep.subr.mxu0 %v4347_v34  ;;  %4866 = vmatprep.subr.bf16.mxu1 %v4865_v59 }
 0xca3   : > { %v3259_v2 = vpop.f32.mrb[20].mxu0 }
 0xca4   : > { %v3339_v3 = vmul.f32 0.35355338, %v3259_v2  ;;  %v4718_v4 = vpop.f32.mrb[21].mxu0 }
 0xca6   : > { %v3341_v5 = vsel %vm1317_vm8, -1e+09, %v3339_v3 }
 0xca7   : > { %v3335_v6 = vpop.f32.mrb[22].mxu0  ;;  %v3343_v8 = vsel %vm1127_vm3, %v3341_v5, -inf }
 0xca8   : > { %v3340_v9 = vmul.f32 0.35355338, %v3335_v6  ;;  %3344 = vmax.xlane.f32.xlu0 %v3343_v8  ;;  %v4723_v10 = vpop.f32.mrb[23].mxu0  ;;  %v4351_v6 = vld [vmem:[%s5831_s6] ss:$0 sm:$0xff]  ;;  %s4996_s6 = scalar_lea.vmem %s5665_s0, 1024 }
 0xca9   : > { %p4997_p12 = scmp.ne.s32.totalorder %s5665_s0, %s4996_s6 }
 0xcaa   : > { %v3342_v11 = vsel %vm1318_vm7, -1e+09, %v3340_v9 }
 0xcab   : > { %v3346_v12 = vsel %vm1127_vm3, %v3342_v11, -inf  ;;  %p4998_p13 = pnand %p4997_p12, %p5239_p5 }
 0xcac   : > { %3347 = vmax.xlane.f32.xlu1 %v3346_v12  ;;  %v4352_v12 = vld [vmem:[%s5832_s5] ss:$0 sm:$0xff]  ;;  %s5002_s5 = scalar_lea.vmem %s5001_s2, 2048 }
 0xcad   : > { %p4999_p0 = pneg %p4998_p13  ;;  %p5004_p3 = scmp.lt.s32.totalorder %s5002_s5, %s4996_s6 }
 0xcaf   : > { %p5005_p4 = por %p5004_p3, %p5003_p1 }
 0xcb1   : > { %p5006_p7 = pnand %p5005_p4, %p4999_p0 }
 0xd35   : > { %v3345_v16 = vpop.xlane.xlu0 %3344 }
 0xd36   : > { %v3349_v13 = vsub.f32 %v3341_v5, %v3345_v16 }
 0xd38   : > { %v3351_v15 = vmul.f32 1.442695, %v3349_v13 }
 0xd39   : > { %v3348_v17 = vpop.xlane.xlu1 %3347 }
 0xd3a   : > { %4972 = vpow2.f32 %v3351_v15  ;;  %v3350_v52 = vsub.f32 %v3342_v11, %v3348_v17  ;;  %v3801_v17 = vld [vmem:[%s5319_s8] sm:$0xff] }
 0xd3c   : > { %v3353_v18 = vmul.f32 1.442695, %v3350_v52  ;;  %v3802_v52 = vld [vmem:[%s5319_s8 + $0x8] sm:$0xff] }
 0xd3e   : > { %4974 = vpow2.f32 %v3353_v18  ;;  %v4873_v18 = vpack.c.bf16 %v3802_v52, %v3801_v17 }
 0xd44   : > { %v4973_v19 = vpop.eup %4972 }
 0xd45   : > { %v3355_v20 = vsel %vm1127_vm3, %v4973_v19, 0.0 }
 0xd46   : > { %3356 = vadd.xlane.f32.xlu0 %v3355_v20  ;;  %v3804_v20 = vld [vmem:[%s5319_s8 + $0x18] sm:$0xff] }
 0xd48   : > { %v4975_v21 = vpop.eup %4974 }
 0xd49   : > { %v3358_v50 = vsel %vm1127_vm3, %v4975_v21, 0.0 }
 0xd4a   : > { %3359 = vadd.xlane.f32.xlu1 %v3358_v50  ;;  %v3805_v50 = vld [vmem:[%s5319_s8 + $0x20] sm:$0xff] }
 0xd4b   : > { %v4881_v23 = vpack.c.bf16 %v3806_v22, %v3805_v50  ;;  %v4356_v50 = vld [vmem:[%s842_s25] ss:$0 sm:$0xff] }
 0xdd3   : > { %v3357_v27 = vpop.xlane.xlu0 %3356 }
 0xdd4   : > { %4976 = vrcp.f32 %v3357_v27  ;;  %v4353_v27 = vld [vmem:[%s834_s4] ss:$0 sm:$0xff] }
 0xdd7   : > { %v3360_v28 = vpop.xlane.xlu1 %3359 }
 0xdd8   : > { %4978 = vrcp.f32 %v3360_v28 }
 0xdde   : > { %v4977_v29 = vpop.eup %4976 }
 0xddf   : > { %v3362_v30 = vmul.f32 %v4977_v29, %v4973_v19  ;;  %v3803_v19 = vld [vmem:[%s5319_s8 + $0x10] sm:$0xff] }
 0xde1   : > { %4343 = vst.msk [vmem:[%s5333_s18 + $0x30] sm:$0xff] %vm1127_vm3, %v3362_v30  ;;  %4727 = vmatmul.mubr.msk.f32.vlgmr.msra.gmra.mrb[30].mxu1 %vm1127_vm3, %v3362_v30 }
 0xde2   : > { %v4979_v31 = vpop.eup %4978  ;;  %4868 = vmatpush3.bf16.msra.mxu1 %v4865_v59 }
 0xde3   : > { %v3364_v32 = vmul.f32 %v4979_v31, %v4975_v21  ;;  %4870 = vmatprep.subr.bf16.mxu1 %v4869_v62  ;;  %v4877_v21 = vpack.c.bf16 %v3804_v20, %v3803_v19 }
 0xde5   : > { %4344 = vst.msk [vmem:[%s5333_s18 + $0x38] sm:$0xff] %vm1127_vm3, %v3364_v32  ;;  %4732 = vmatmul.mubr.msk.f32.vlgmr.msra.gmra.mrb[24].mxu0 %vm1127_vm3, %v3364_v32 }
 0xde6   : > { %4735 = vmatpush3.msra.mxu0 %v4347_v34  ;;  %4872 = vmatpush3.bf16.msra.mxu1 %v4869_v62 }
 0xde7   : > { %4874 = vmatprep.subr.bf16.mxu0 %v4873_v18 }
 0xeb4   : > { %v3437_v36 = vpop.f32.mrb[30].mxu1 }
 0xeb5   : > { %v4728_v37 = vpop.f32.mrb[31].mxu1  ;;  %4736 = vmatprep.mubr.msk.f32.mxu0 %vm1127_vm3, %v3437_v36 }
 0xeb8   : > { %v3510_v38 = vpop.f32.mrb[24].mxu0 }
 0xeb9   : > { %v4733_v39 = vpop.f32.mrb[25].mxu0  ;;  %4737 = vmatmul.mubr.msk.f32.vlgmr.msra.gmra.mrb[10].mxu0 %vm1127_vm3, %v3510_v38 }
 0xeba   : > { %4876 = vmatpush3.bf16.msra.mxu0 %v4873_v18 }
 0xebb   : > { %4878 = vmatprep.subr.bf16.mxu0 %v4877_v21 }
 0xebe   : > { %4880 = vmatpush3.bf16.msra.mxu0 %v4877_v21 }
 0xebf   : > { %4882 = vmatprep.subr.bf16.mxu0 %v4881_v23 }
 0xec2   : > { %4884 = vmatpush3.bf16.msra.mxu0 %v4881_v23 }
 0xec3   : > { %4886 = vmatprep.subr.bf16.mxu0 %v4885_v26 }
 0xec6   : > { %4888 = vmatpush3.bf16.msra.mxu0 %v4885_v26 }
 0xf8c   : > { %v4738_v41 = vpop.f32.mrb[10].mxu0 }
 0xf8d   : > { %v3607_v42 = vadd.f32 %v4738_v41, %v4350_v40  ;;  %v3588_v43 = vpop.f32.mrb[11].mxu0 }
 0xf8e   : > { %v3606_v44 = vadd.f32 %v4350_v40, %v3588_v43 }
 0xf8f   : > { %v3609_v45 = vadd.f32 %v3607_v42, %v5356_v14 }
 0xf90   : > { %v3608_v46 = vadd.f32 %v3606_v44, %v5346_v7 }
 0xf91   : > { %v3613_v47 = vsel %vm873_vm1, %v3609_v45, 0.0 }
 0xf92   : > { %3614 = vadd.xlane.f32.xlu1 %v3613_v47  ;;  %v3610_v48 = vsel %vm873_vm1, %v3608_v46, 0.0 }
 0xf93   : > { %3611 = vadd.xlane.f32.xlu0 %v3610_v48 }
0x101f   : > { %v3615_v49 = vpop.xlane.xlu1 %3614 }
0x1020   : > { %v3618_v51 = vmul.f32 0.03125, %v3615_v49  ;;  %v3612_v35 = vpop.xlane.xlu0 %3611 }
0x1021   : > { %v3617_v53 = vmul.f32 0.03125, %v3612_v35 }
0x1022   : > { %v3620_v54 = vsub.f32 %v3609_v45, %v3618_v51 }
0x1023   : > { %v3619_v55 = vsub.f32 %v3608_v46, %v3617_v53 }
0x1024   : > { %v3622_v56 = vmul.f32 %v3620_v54, %v3620_v54 }
0x1025   : > { %v3621_v14 = vmul.f32 %v3619_v55, %v3619_v55 }
0x1026   : > { %v3626_v7 = vsel %vm873_vm1, %v3622_v56, 0.0 }
0x1027   : > { %3627 = vadd.xlane.f32.xlu1 %v3626_v7  ;;  %v3623_v33 = vsel %vm873_vm1, %v3621_v14, 0.0 }
0x1028   : > { %3624 = vadd.xlane.f32.xlu0 %v3623_v33 }
0x10b4   : > { %v3628_v63 = vpop.xlane.xlu1 %3627 }
0x10b5   : > { %v3630_v0 = vmul.f32 0.03125, %v3628_v63  ;;  %v3625_v1 = vpop.xlane.xlu0 %3624 }
0x10b6   : > { %v3629_v2 = vmul.f32 0.03125, %v3625_v1 }
0x10b7   : > { %v3632_v3 = vadd.f32 1e-12, %v3630_v0 }
0x10b8   : > { %v3631_v4 = vadd.f32 1e-12, %v3629_v2 }
0x10b9   : > { %4980 = vrsqrt.f32 %v3632_v3 }
0x10ba   : > { %4982 = vrsqrt.f32 %v3631_v4 }
0x10c3   : > { %v4981_v5 = vpop.eup %4980 }
0x10c4   : > { %v4983_v8 = vpop.eup %4982  ;;  %v3636_v9 = vmul.f32 %v4981_v5, %v3620_v54 }
0x10c5   : > { %v3635_v10 = vmul.f32 %v4983_v8, %v3619_v55  ;;  %v5094_v8 = vmov -1.0  }
0x10c6   : > { %v3645_v11 = vmul.f32 %v4351_v6, %v3636_v9 }
0x10c7   : > { %v3644_v16 = vmul.f32 %v4351_v6, %v3635_v10 }
0x10c8   : > { %v5628_v15 = vadd.f32 %v4352_v12, %v3645_v11 }
0x10c9   : > { %v5626_v13 = vadd.f32 %v4352_v12, %v3644_v16 }
0x10cb   : > { %4747 = vmatprep.mubr.msk.f32.mxu1 %vm873_vm1, %v5626_v13 }
0x10cc   : > { %4748 = vmatmul.mubr.msk.f32.vlgmr.msra.gmra.mrb[32].mxu1 %vm873_vm1, %v5628_v15 }
0x119f   : > { %v4749_v28 = vpop.f32.mrb[32].mxu1 }
0x11a0   : > { %v3744_v29 = vadd.f32 %v4749_v28, %v4353_v27  ;;  %v3738_v30 = vpop.f32.mrb[33].mxu1 }
0x11a1   : > { %v3739_v31 = vadd.f32 %v4353_v27, %v3738_v30 }
0x11a2   : > { %v3750_v32 = vmul.f32 0.70710677, %v3744_v29  ;;  %v3748_v19 = vmul.f32 0.5, %v3744_v29 }
0x11a3   : > { %v3749_v34 = vmul.f32 0.70710677, %v3739_v31  ;;  %v3747_v52 = vmul.f32 0.5, %v3739_v31 }
0x11a4   : > { %v3756_v36 = vand.u32 2147483647, %v3750_v32  ;;  %vm3752_vm9 = vcmp.ge.f32.partialorder %v3750_v32, 0.0 }
0x11a5   : > { %v3755_v37 = vand.u32 2147483647, %v3749_v34  ;;  %vm3751_vm10 = vcmp.ge.f32.partialorder %v3749_v34, 0.0  ;;  %v3754_v9 = vsel %vm3752_vm9, 1.0, %v5094_v8 }
0x11a6   : > { %v3758_v38 = vmul.f32 0.3275911, %v3756_v36  ;;  %v3784_v42 = vsub.f32 0.0, %v3756_v36  ;;  %v3753_v12 = vsel %vm3751_vm10, 1.0, %v5094_v8 }
0x11a7   : > { %v3757_v39 = vmul.f32 0.3275911, %v3755_v37  ;;  %v3783_v43 = vsub.f32 0.0, %v3755_v37 }
0x11a8   : > { %v3760_v40 = vadd.f32 1.0, %v3758_v38  ;;  %v3786_v45 = vmul.f32 %v3784_v42, %v3756_v36 }
0x11a9   : > { %v3759_v41 = vadd.f32 1.0, %v3757_v39  ;;  %v3785_v48 = vmul.f32 %v3783_v43, %v3755_v37 }
0x11aa   : > { %4984 = vrcp.f32 %v3760_v40  ;;  %v3789_v35 = vmul.f32 1.442695, %v3786_v45 }
0x11ab   : > { %4986 = vrcp.f32 %v3759_v41  ;;  %v3787_v55 = vmul.f32 1.442695, %v3785_v48 }
0x11ac   : > { %4988 = vpow2.f32 %v3789_v35 }
0x11ad   : > { %4990 = vpow2.f32 %v3787_v55 }
0x11b4   : > { %v4985_v44 = vpop.eup %4984 }
0x11b5   : > { %v4987_v46 = vpop.eup %4986  ;;  %v3766_v47 = vmul.f32 1.0614054, %v4985_v44 }
0x11b6   : > { %v3765_v49 = vmul.f32 1.0614054, %v4987_v46  ;;  %v4989_v1 = vpop.eup %4988 }
0x11b7   : > { %v3768_v51 = vadd.f32 -1.4531521, %v3766_v47  ;;  %v4991_v3 = vpop.eup %4990 }
0x11b8   : > { %v3767_v53 = vadd.f32 -1.4531521, %v3765_v49 }
0x11b9   : > { %v3770_v54 = vmul.f32 %v4985_v44, %v3768_v51 }
0x11ba   : > { %v3769_v56 = vmul.f32 %v4987_v46, %v3767_v53 }
0x11bb   : > { %v3772_v14 = vadd.f32 1.4214138, %v3770_v54 }
0x11bc   : > { %v3771_v7 = vadd.f32 1.4214138, %v3769_v56 }
0x11bd   : > { %v3774_v33 = vmul.f32 %v4985_v44, %v3772_v14 }
0x11be   : > { %v3773_v57 = vmul.f32 %v4987_v46, %v3771_v7 }
0x11bf   : > { %v3776_v58 = vadd.f32 -0.28449672, %v3774_v33 }
0x11c0   : > { %v3775_v59 = vadd.f32 -0.28449672, %v3773_v57 }
0x11c1   : > { %v3778_v60 = vmul.f32 %v4985_v44, %v3776_v58 }
0x11c2   : > { %v3777_v61 = vmul.f32 %v4987_v46, %v3775_v59 }
0x11c3   : > { %v3780_v62 = vadd.f32 0.2548296, %v3778_v60 }
0x11c4   : > { %v3779_v63 = vadd.f32 0.2548296, %v3777_v61 }
0x11c5   : > { %v3782_v0 = vmul.f32 %v4985_v44, %v3780_v62 }
0x11c6   : > { %v3781_v2 = vmul.f32 %v4987_v46, %v3779_v63 }
0x11c7   : > { %v3792_v4 = vmul.f32 %v4989_v1, %v3782_v0 }
0x11c8   : > { %v3791_v5 = vmul.f32 %v4991_v3, %v3781_v2 }
0x11c9   : > { %v3794_v6 = vsub.f32 1.0, %v3792_v4 }
0x11ca   : > { %v3793_v10 = vsub.f32 1.0, %v3791_v5 }
0x11cb   : > { %v3796_v11 = vmul.f32 %v3794_v6, %v3754_v9 }
0x11cc   : > { %v3795_v16 = vmul.f32 %v3793_v10, %v3753_v12 }
0x11cd   : > { %v3798_v17 = vadd.f32 1.0, %v3796_v11 }
0x11ce   : > { %v3797_v18 = vadd.f32 1.0, %v3795_v16 }
0x11cf   : > { %v3800_v21 = vmul.f32 %v3798_v17, %v3748_v19 }
0x11d0   : > { %v3799_v20 = vmul.f32 %v3797_v18, %v3747_v52 }
0x11d2   : > { %4766 = vmatprep.mubr.msk.f32.mxu0 %vm3816_vm11, %v3799_v20 }
0x11d3   : > { %4767 = vmatmul.mubr.msk.f32.vlgmr.msra.gmra.mrb[26].mxu0 %vm3816_vm11, %v3800_v21 }
0x12a6   : > { %v4768_v22 = vpop.f32.mrb[26].mxu0 }
0x12a7   : > { %v3895_v23 = vadd.f32 %v4768_v22, %v4356_v50  ;;  %v3889_v24 = vpop.f32.mrb[27].mxu0 }
0x12a8   : > { %v3890_v25 = vadd.f32 %v4356_v50, %v3889_v24 }
0x12a9   : > { %v3899_v26 = vadd.f32 %v3895_v23, %v5628_v15 }
0x12aa   : > { %v3898_v27 = vadd.f32 %v3890_v25, %v5626_v13 }
0x12ab   : > { %v3903_v28 = vsel %vm873_vm1, %v3899_v26, 0.0 }
0x12ac   : > { %3904 = vadd.xlane.f32.xlu1 %v3903_v28  ;;  %v3900_v29 = vsel %vm873_vm1, %v3898_v27, 0.0 }
0x12ad   : > { %3901 = vadd.xlane.f32.xlu0 %v3900_v29 }
0x1339   : > { %v3905_v30 = vpop.xlane.xlu1 %3904 }
0x133a   : > { %v3907_v31 = vmul.f32 0.03125, %v3905_v30  ;;  %v3902_v32 = vpop.xlane.xlu0 %3901 }
0x133b   : > { %v3906_v34 = vmul.f32 0.03125, %v3902_v32 }
0x133c   : > { %v3909_v36 = vsub.f32 %v3899_v26, %v3907_v31 }
0x133d   : > { %v3908_v37 = vsub.f32 %v3898_v27, %v3906_v34 }
0x133e   : > { %v3911_v38 = vmul.f32 %v3909_v36, %v3909_v36 }
0x133f   : > { %v3910_v15 = vmul.f32 %v3908_v37, %v3908_v37 }
0x1340   : > { %v3915_v13 = vsel %vm873_vm1, %v3911_v38, 0.0 }
0x1341   : > { %3916 = vadd.xlane.f32.xlu1 %v3915_v13  ;;  %v3912_v39 = vsel %vm873_vm1, %v3910_v15, 0.0 }
0x1342   : > { %3913 = vadd.xlane.f32.xlu0 %v3912_v39 }
0x1343   : > { %5009 = shalt.err (!%p5006_p7)
}
0x1344   : > { %s5010_s18 = scalar_lea.hbm %s5662_s24, 1024  ;;  %s5014_s4 = scalar_lea.hbm %s5836_s17, 2048 }
0x1345   : > { %p5011_p8 = scmp.ne.s32.totalorder %s5662_s24, %s5010_s18  ;;  %p5015_p11 = scmp.lt.u32.totalorder %s5662_s24, %s5836_s17 }
0x1346   : > { %p5016_p12 = scmp.lt.u32.totalorder %s5014_s4, %s5010_s18  ;;  %p5018_p0 = scmp.lt.u32.totalorder %s5010_s18, %s5662_s24 }
0x1347   : > { %p5012_p9 = pnand %p5011_p8, %p5239_p5 }
0x1348   : > { %p5017_p13 = por %p5016_p12, %p5015_p11 }
0x1349   : > { %p5013_p10 = pneg %p5012_p9 }
0x134a   : > { %p5019_p1 = por %p5018_p0, %p5017_p13 }
0x134c   : > { %p5020_p3 = pnand %p5019_p1, %p5013_p10 }
0x134e   : > { %5023 = shalt.err (!%p5020_p3)
}
0x134f   : > { %s5096_s20 = smov 128   ;;  %s5097_s21 = smov 8   ;;  %v4359_v47 = vld [vmem:[%s845_s23] ss:$0 sm:$0xff] }
0x1350   : > { %4897 = dma.vmem_to_hbm [thread:$0]  (%p5239_p5), %s5665_s0, 1024, %s5662_s24, %s5669_s19, %s5096_s20, %s5096_s20, %s5097_s21  }
0x1351   : > { %v4360_v35 = vld [vmem:[%s848_s12] ss:$0 sm:$0xff]  ;;  %s5098_s19 = smov [#allocation2]  }
0x1352   : > { %s3957_s6 = sshll.u32 %s5098_s19, 4  ;;  %s3958_s6 = int_to_ptr.vmem [resolvable:$true] %s3957_s6 }
0x1353   : > { %s5024_s23 = scalar_lea.vmem %s3958_s6, 256  ;;  %p5031_p8 = scmp.lt.s32.totalorder %s3958_s6, %s3958_s6 }
0x1354   : > { %p5025_p5 = scmp.ne.s32.totalorder %s3958_s6, %s5024_s23  ;;  %p5032_p9 = scmp.lt.s32.totalorder %s5024_s23, %s5024_s23 }
0x1356   : > { %p5026_p4 = pnand %p5025_p5, %p531_p2  ;;  %p5033_p10 = por %p5032_p9, %p5031_p8 }
0x1358   : > { %p5027_p7 = pneg %p5026_p4 }
0x135a   : > { %p5034_p11 = pnand %p5033_p10, %p5027_p7 }
0x13ce   : > { %v3917_v40 = vpop.xlane.xlu1 %3916 }
0x13cf   : > { %v3919_v41 = vmul.f32 0.03125, %v3917_v40  ;;  %v3914_v42 = vpop.xlane.xlu0 %3913 }
0x13d0   : > { %v3918_v43 = vmul.f32 0.03125, %v3914_v42 }
0x13d1   : > { %v3921_v44 = vadd.f32 1e-12, %v3919_v41 }
0x13d2   : > { %v3920_v45 = vadd.f32 1e-12, %v3918_v43 }
0x13d3   : > { %4992 = vrsqrt.f32 %v3921_v44 }
0x13d4   : > { %4994 = vrsqrt.f32 %v3920_v45 }
0x13dd   : > { %v4993_v46 = vpop.eup %4992 }
0x13de   : > { %v4995_v48 = vpop.eup %4994  ;;  %v3925_v49 = vmul.f32 %v4993_v46, %v3909_v36 }
0x13df   : > { %v3924_v51 = vmul.f32 %v4995_v48, %v3908_v37 }
0x13e0   : > { %v3934_v53 = vmul.f32 %v4359_v47, %v3925_v49 }
0x13e1   : > { %v3933_v54 = vmul.f32 %v4359_v47, %v3924_v51 }
0x13e2   : > { %v3943_v55 = vadd.f32 %v4360_v35, %v3934_v53 }
0x13e3   : > { %v3942_v56 = vadd.f32 %v4360_v35, %v3933_v54 }
0x13e4   : > { %3945 = vst.msk [vmem:[#allocation2 + $0x8] sm:$0xff] %vm873_vm1, %v3943_v55 }
0x13e5   : > { %3944 = vst.msk [vmem:[#allocation2] sm:$0xff] %vm873_vm1, %v3942_v56 }
0x13e6   : > { %5037 = shalt.err (!%p5034_p11)
}
0x13e7   : > { %s5839_s7 = sld [smem:[#allocation31_spill]] }
0x13ed   : > { %s5038_s2 = scalar_lea.hbm %s5839_s7, 256 }
0x13ee   : > { %p5039_p12 = scmp.ne.s32.totalorder %s5839_s7, %s5038_s2  ;;  %p5044_p1 = scmp.lt.u32.totalorder %s5038_s2, %s5839_s7 }
0x13f0   : > { %p5040_p13 = pnand %p5039_p12, %p531_p2 }
0x13f2   : > { %p5041_p0 = pneg %p5040_p13 }
0x13f4   : > { %p5046_p3 = pnand %p5044_p1, %p5041_p0 }
0x13f6   : > { %5049 = shalt.err (!%p5046_p3)
}
0x13f7   : > { %4896 = dma.vmem_to_hbm [thread:$0]  (%p531_p2), %s3958_s6, 256, %s5839_s7, [#allocation3], %s5096_s20, %s5096_s20, %s5097_s21  }
0x13f8   : > { %5067 = dma.done.wait (%p531_p2), [#allocation3], 256  }
0x13f9   : > { %5069 = vsyncadd (%p531_p2), [#allocation3], 4294967040 }
0x13fa PF: > { %s5840_s22 = sld [smem:[#allocation11_spill]]  ;;  %s5841_s27 = sld [smem:[#allocation8_spill]] }
0x1400   : > { %p4907_p5 = scmp.ge.s32.totalorder %s5840_s22, 2  ;;  %s3992_s25 = sand.u32 1, %s5841_s27  }
0x1401   : > { %s3993_s24 = scalar_lea.sflag [#allocation5], %s3992_s25 }
0x1402   : > { %p4902_p4 = pnand %p4907_p5, %p5243_p6 }
0x1404   : > { %5071 = dma.done.wait (!%p4902_p4), %s3993_s24, 1024  }
0x1405   : > { %5073 = vsyncadd (!%p4902_p4), %s3993_s24, 4294966272  ;;  %s5843_s21 = sld [smem:[#allocation13_spill]]  ;;  %s5844_s0 = sld [smem:[#allocation9_spill]] }
0x1406   : > { %s5845_s30 = sld [smem:[#allocation10_spill]]  ;;  %s5846_s20 = sld [smem:[#allocation14_spill]] }
0x140b   : > { %p31_p7 = scmp.ge.s32.totalorder %s5843_s21, 4  }
0x140d   :  { %33 = sbr.rel (!%p31_p7) target bundleno = 18 (0x12), region = 209 }
0x1414   :  { %3998 = vsyncpa [#allocation3], 1 }
0x1415   :  { %4000 = vsyncpa [#allocation3 + $0x1], 1 }
0x1416   :  { %4001 = vsyncpa [#allocation5], 1 }
0x1417   :  { %4003 = vsyncpa [#allocation5 + $0x1], 1 }

</bundles_post_ra>
